<compile_context>
chip_gen: v6e
topology: v6e:2x2x1
jax: 0.10.0
libtpu: 0.0.40
codegen_flags: <defaults>
</compile_context>

<pallas_src>
import functools

import jax
import jax.numpy as jnp
import numpy as np
from jax import lax
from jax.experimental import pallas as pl
from jax.experimental.pallas import tpu as pltpu


# ----------------------------------------------------------------------------
# Fused embedding-gather + GRU recurrence + dense head, single kernel invocation.
# PyTorch GRU gate math (gate order r, z, n):
#   r = sigmoid(x W_ir + b_ir + h W_hr + b_hr)
#   z = sigmoid(x W_iz + b_iz + h W_hz + b_hz)
#   n = tanh   (x W_in + b_in + r * (h W_hn + b_hn))
#   h = (1 - z) * n + z * h_prev
# ----------------------------------------------------------------------------
def _gru_dense_kernel(ids_ref,   # [T*Bp, 1] int32 token ids, time-major (row = t*Bp + b)
                      emb_ref,   # [Vp, E]   embedding table (pad rows zero)
                      h0_ref,    # [Bp, Hp]  initial hidden state (lane-padded)
                      wih_ref,   # [E, 3Hp]  fused input->hidden weights, gate-lane-aligned
                      whh_ref,   # [Hp, 3Hp] fused hidden->hidden weights, gate-lane-aligned
                      bx_ref,    # [1, 3Hp]  b_ih + [b_hr | b_hz | 0] (hoisted bias)
                      bhn_ref,   # [1, Hp]   b_hn (must stay inside r * (...))
                      wd_ref,    # [Hp, Cp]  dense (classifier) weight, lane-padded
                      bd_ref,    # [1, Cp]   dense bias, lane-padded
                      out_ref,   # [Bp, Cp]  logits
                      xg_sc):    # VMEM scratch [T*Bp, 3Hp] f32
    Bp, Hp = h0_ref.shape
    TB = ids_ref.shape[0]
    T = TB // Bp
    Vp = emb_ref.shape[0]

    # (0) In-kernel embedding gather as an exact one-hot MXU matmul (the one-hot row
    #     selects exactly one table row, so the result is bit-exact vs. a gather).
    #     Avoids writing the [T*Bp, E] activation slab to HBM and DMAing it back.
    #     TODO(synk): for large vocabularies use a per-row DMA gather instead of the
    #     whole-table-in-VMEM / one-hot approach.
    onehot = (ids_ref[...] ==
              lax.broadcasted_iota(jnp.int32, (TB, Vp), 1)).astype(jnp.float32)
    x = jnp.dot(onehot, emb_ref[...], preferred_element_type=jnp.float32)   # [TB, E]

    # (1) Hoisted input projection for ALL timesteps: one MXU matmul; b_ih plus the
    #     r/z slices of b_hh are folded in here, so the loop only adds b_hn.
    xg_sc[...] = (jnp.dot(x, wih_ref[...], preferred_element_type=jnp.float32)
                  + bx_ref[...])

    # Hoist loop-invariant loads out of the recurrence.
    whh = whh_ref[...]
    bhn = bhn_ref[...]

    # (2) Serial recurrence: only h @ W_hh + gate VPU/EUP math on the critical path.
    #     Gates are 128-lane aligned (gate g at lanes [g*Hp, (g+1)*Hp)), so every slice
    #     below is a whole-vreg slice.
    #     TODO(synk): hold W_hh resident in MXU staging registers across the loop
    #     (pltpu.matmul_push_rhs / matmul_acc_lhs / matmul_pop); skipped because the
    #     accumulator/pop semantics differ between MRF (v5e/v6e) and MRB (v7x) and
    #     jnp.dot is the portable, known-good lowering.
    def step(t, h):
        row = pl.multiple_of(t * Bp, Bp)                                  # Bp-aligned
        g_x = xg_sc[pl.ds(row, Bp), :]                                    # [Bp, 3Hp]
        g_h = jnp.dot(h, whh, preferred_element_type=jnp.float32)         # [Bp, 3Hp]
        # One EUP pass over the combined r|z slab instead of two sigmoids.
        rz = jax.nn.sigmoid(g_x[:, :2 * Hp] + g_h[:, :2 * Hp])
        r = rz[:, :Hp]
        z = rz[:, Hp:]
        n = jnp.tanh(g_x[:, 2 * Hp:] + r * (g_h[:, 2 * Hp:] + bhn))
        return n + z * (h - n)                       # == (1 - z) * n + z * h

    # Cap the unroll so long sequences don't blow past the 64-vreg file.
    h_last = lax.fori_loop(0, T, step, h0_ref[...], unroll=min(T, 8))

    # (3) output[:, -1, :] -> dropout(p=0, identity) -> dense head.
    #     Cp is a multiple of 128 -> lane-dense, unmasked store.
    out_ref[...] = (jnp.dot(h_last, wd_ref[...], preferred_element_type=jnp.float32)
                    + bd_ref[...]).astype(out_ref.dtype)


@functools.partial(jax.jit, static_argnames=("num_classes",))
def rnn_forward(texts, params, h0, *, num_classes):
    """texts: int32 [B, T].  h0: [B, H].  Returns logits [B, num_classes]."""
    emb = params["embedding"]                    # [V, E] (pad row is zero)
    B, T = texts.shape
    V, E = emb.shape
    H = params["whh"].shape[0]
    C = num_classes

    Bp = max(8, -(-B // 8) * 8)                  # sublane-dense batch (f32 -> 8)
    Hp = max(128, -(-H // 128) * 128)            # lane-aligned per-gate width
    Cp = max(128, -(-C // 128) * 128)            # lane-dense classifier output
    Vp = max(128, -(-V // 128) * 128)            # lane-dense one-hot contraction dim

    # Pad batch with pad-token rows / zero state (extra rows sliced off at the end);
    # transpose the tiny id matrix (not activations) so row = t*Bp + b (time-major).
    texts_p = jnp.pad(texts.astype(jnp.int32), ((0, Bp - B), (0, 0)))
    ids = texts_p.T.reshape(T * Bp, 1)
    h0_p = jnp.pad(h0, ((0, Bp - B), (0, Hp - H)))
    emb_p = jnp.pad(emb, ((0, Vp - V), (0, 0)))

    # Lane-align each GRU gate: gate g occupies lanes [g*Hp, g*Hp + H), rest zero.
    def pad_gates(w, row_pad):
        rows = w.shape[0]
        w3 = w.reshape(rows, 3, H)
        w3 = jnp.pad(w3, ((0, row_pad), (0, 0), (0, Hp - H)))
        return w3.reshape(rows + row_pad, 3 * Hp)

    wih_p = pad_gates(params["wih"], 0)          # [E,  3Hp]
    whh_p = pad_gates(params["whh"], Hp - H)     # [Hp, 3Hp] (rows padded like h)
    bih_p = pad_gates(params["bih"], 0)          # [1,  3Hp]
    bhh_p = pad_gates(params["bhh"], 0)          # [1,  3Hp]

    # Fold b_ih and the r/z slices of b_hh into the hoisted-projection bias; b_hn
    # must stay inside r * (h W_hn + b_hn), so it is passed separately.
    bx_p = bih_p + bhh_p.at[:, 2 * Hp:].set(0.0)
    bhn_p = bhh_p[:, 2 * Hp:]

    # Zero-pad the dense head to lane-dense widths.
    wd_p = jnp.pad(params["wd"], ((0, Hp - H), (0, Cp - C)))
    bd_p = jnp.pad(params["bd"], ((0, 0), (0, Cp - C)))

    # Weights/activations kept f32 so the 1e-5 reference check stays tight; bf16 MXU
    # inputs on v6e/v7x are a per-generation knob (gate math stays f32 on v5e).
    out_p = pl.pallas_call(
        _gru_dense_kernel,
        out_shape=jax.ShapeDtypeStruct((Bp, Cp), jnp.float32),
        grid=(1,),
        # TODO(synk): for realistic T/B add a batch-parallel grid axis (use v7x's
        # second TensorCore) and tile the hoisted projection over T so its DMAs
        # pipeline against the MXU; unnecessary at these toy shapes.
        in_specs=[
            pl.BlockSpec((T * Bp, 1), lambda i: (0, 0)),      # token ids (time-major)
            pl.BlockSpec((Vp, E), lambda i: (0, 0)),          # embedding table
            pl.BlockSpec((Bp, Hp), lambda i: (0, 0)),         # h0
            pl.BlockSpec((E, 3 * Hp), lambda i: (0, 0)),      # W_ih fused, gate-aligned
            pl.BlockSpec((Hp, 3 * Hp), lambda i: (0, 0)),     # W_hh fused, gate-aligned
            pl.BlockSpec((1, 3 * Hp), lambda i: (0, 0)),      # hoisted bias
            pl.BlockSpec((1, Hp), lambda i: (0, 0)),          # b_hn
            pl.BlockSpec((Hp, Cp), lambda i: (0, 0)),         # W_dense (padded)
            pl.BlockSpec((1, Cp), lambda i: (0, 0)),          # b_dense (padded)
        ],
        out_specs=pl.BlockSpec((Bp, Cp), lambda i: (0, 0)),
        scratch_shapes=[pltpu.VMEM((T * Bp, 3 * Hp), jnp.float32)],
        compiler_params=pltpu.CompilerParams(
            dimension_semantics=("arbitrary",),
            # Explicit limit: v5e's scoped-VMEM default is only 16 MiB.
            vmem_limit_bytes=32 * 1024 * 1024),
    )(ids, emb_p, h0_p, wih_p, whh_p, bx_p, bhn_p, wd_p, bd_p)

    return out_p[:B, :C]


def init_params(key, vocab_size, embed_size, hidden_size, num_classes, pad_idx):
    """Deterministic init; GRU weights stored fused & pre-transposed: [in, 3H]."""
    ks = jax.random.split(key, 8)
    k = 1.0 / np.sqrt(hidden_size)
    emb = jax.random.normal(ks[0], (vocab_size, embed_size), jnp.float32)
    emb = emb.at[pad_idx].set(0.0)                       # padding_idx row is zero
    params = {
        "embedding": emb,
        "wih": jax.random.uniform(ks[1], (embed_size, 3 * hidden_size), jnp.float32, -k, k),
        "whh": jax.random.uniform(ks[2], (hidden_size, 3 * hidden_size), jnp.float32, -k, k),
        "bih": jax.random.uniform(ks[3], (1, 3 * hidden_size), jnp.float32, -k, k),
        "bhh": jax.random.uniform(ks[4], (1, 3 * hidden_size), jnp.float32, -k, k),
        "wd": jax.random.uniform(ks[5], (hidden_size, num_classes), jnp.float32, -k, k),
        "bd": jax.random.uniform(ks[6], (1, num_classes), jnp.float32, -k, k),
    }
    return params, ks[7]


def reference_forward(texts, params, h0):
    """Pure-JAX reference (lax.scan GRU) for correctness check."""
    H = h0.shape[-1]
    x = jnp.take(params["embedding"], texts.astype(jnp.int32), axis=0)  # [B, T, E]
    x = jnp.transpose(x, (1, 0, 2))                                     # [T, B, E]

    def step(h, x_t):
        gi = x_t @ params["wih"] + params["bih"]
        gh = h @ params["whh"] + params["bhh"]
        r = jax.nn.sigmoid(gi[:, :H] + gh[:, :H])
        z = jax.nn.sigmoid(gi[:, H:2 * H] + gh[:, H:2 * H])
        n = jnp.tanh(gi[:, 2 * H:] + r * (gh[:, 2 * H:] - params["bhh"][:, 2 * H:]
                                          + params["bhh"][:, 2 * H:]))
        return (1.0 - z) * n + z * h, None

    h_last, _ = lax.scan(step, h0, x)
    return h_last @ params["wd"] + params["bd"]


if __name__ == "__main__":
    # Module config (num_layers=1, bidirectional=False, dropout=0.0)
    VOCAB, EMBED, HIDDEN, CLASSES, PAD = 50, 32, 32, 8, 0
    B, MAX_LEN = 2, 8

    key = jax.random.PRNGKey(0)
    params, key = init_params(key, VOCAB, EMBED, HIDDEN, CLASSES, PAD)

    k_text, k_h0 = jax.random.split(key)
    texts = jax.random.randint(k_text, (B, MAX_LEN), 0, VOCAB, dtype=jnp.int32)
    # PyTorch samples randn(D*num_layers, B, H) inside forward; D*num_layers=1.
    h0 = jax.random.normal(k_h0, (1, B, HIDDEN), jnp.float32)[0]        # [B, H]

    out = rnn_forward(texts, params, h0, num_classes=CLASSES)
    out = jax.block_until_ready(out)

    ref = reference_forward(texts, params, h0)
    np.testing.assert_allclose(np.asarray(out), np.asarray(ref), rtol=1e-5, atol=1e-5)
    assert out.shape == (B, CLASSES)
    print("KERNEL_OK")
</pallas_src>

<mosaic_0001>
module attributes {stable_mosaic.version = 11 : i64} {
  func.func @_gru_dense_kernel(%arg0: i32, %arg1: memref<64x1xi32, #tpu.memory_space<vmem>>, %arg2: memref<128x32xf32, #tpu.memory_space<vmem>>, %arg3: memref<8x128xf32, #tpu.memory_space<vmem>>, %arg4: memref<32x384xf32, #tpu.memory_space<vmem>>, %arg5: memref<128x384xf32, #tpu.memory_space<vmem>>, %arg6: memref<1x384xf32, #tpu.memory_space<vmem>>, %arg7: memref<1x128xf32, #tpu.memory_space<vmem>>, %arg8: memref<128x128xf32, #tpu.memory_space<vmem>>, %arg9: memref<1x128xf32, #tpu.memory_space<vmem>>, %arg10: memref<8x128xf32, #tpu.memory_space<vmem>>, %arg11: memref<64x384xf32, #tpu.memory_space<vmem>>) attributes {dimension_semantics = [#tpu.dimension_semantics<arbitrary>], iteration_bounds = array<i64: 1>, scalar_prefetch = 0 : i64, scratch_operands = 1 : i64, tpu.core_type = #tpu.core_type<tc>, window_params = [{pipeline_mode = #tpu.pipeline_mode<synchronous>, transform_indices = @transform_0, window_bounds = array<i64: 64, 1>}, {pipeline_mode = #tpu.pipeline_mode<synchronous>, transform_indices = @transform_1, window_bounds = array<i64: 128, 32>}, {pipeline_mode = #tpu.pipeline_mode<synchronous>, transform_indices = @transform_2, window_bounds = array<i64: 8, 128>}, {pipeline_mode = #tpu.pipeline_mode<synchronous>, transform_indices = @transform_3, window_bounds = array<i64: 32, 384>}, {pipeline_mode = #tpu.pipeline_mode<synchronous>, transform_indices = @transform_4, window_bounds = array<i64: 128, 384>}, {pipeline_mode = #tpu.pipeline_mode<synchronous>, transform_indices = @transform_5, window_bounds = array<i64: 1, 384>}, {pipeline_mode = #tpu.pipeline_mode<synchronous>, transform_indices = @transform_6, window_bounds = array<i64: 1, 128>}, {pipeline_mode = #tpu.pipeline_mode<synchronous>, transform_indices = @transform_7, window_bounds = array<i64: 128, 128>}, {pipeline_mode = #tpu.pipeline_mode<synchronous>, transform_indices = @transform_8, window_bounds = array<i64: 1, 128>}, {pipeline_mode = #tpu.pipeline_mode<synchronous>, transform_indices = @transform_9, window_bounds = array<i64: 8, 128>}]} {
    %c0 = arith.constant 0 : index
    %c0_0 = arith.constant 0 : index
    %0 = vector.load %arg1[%c0, %c0_0] : memref<64x1xi32, #tpu.memory_space<vmem>>, vector<64x1xi32>
    %1 = tpu.iota {dimensions = array<i32: 1>} : vector<64x128xi32>
    %2 = vector.broadcast %0 : vector<64x1xi32> to vector<64x128xi32>
    %3 = arith.cmpi eq, %2, %1 : vector<64x128xi32>
    %4 = arith.extui %3 : vector<64x128xi1> to vector<64x128xi32>
    %5 = arith.sitofp %4 : vector<64x128xi32> to vector<64x128xf32>
    %c0_1 = arith.constant 0 : index
    %c0_2 = arith.constant 0 : index
    %6 = vector.load %arg2[%c0_1, %c0_2] : memref<128x32xf32, #tpu.memory_space<vmem>>, vector<128x32xf32>
    %cst = arith.constant dense<0.000000e+00> : vector<64x32xf32>
    %7 = tpu.matmul %5, %6, %cst {dimension_numbers = #tpu.dot_dimension_numbers<[1], [0], [0], [1], [0, 0, 1, 1], [], []>} : vector<64x128xf32>, vector<128x32xf32>, vector<64x32xf32> -> vector<64x32xf32>
    %c0_3 = arith.constant 0 : index
    %c0_4 = arith.constant 0 : index
    %8 = vector.load %arg4[%c0_3, %c0_4] : memref<32x384xf32, #tpu.memory_space<vmem>>, vector<32x384xf32>
    %cst_5 = arith.constant dense<0.000000e+00> : vector<64x384xf32>
    %9 = tpu.matmul %7, %8, %cst_5 {dimension_numbers = #tpu.dot_dimension_numbers<[1], [0], [0], [1], [0, 0, 1, 1], [], []>} : vector<64x32xf32>, vector<32x384xf32>, vector<64x384xf32> -> vector<64x384xf32>
    %c0_6 = arith.constant 0 : index
    %c0_7 = arith.constant 0 : index
    %10 = vector.load %arg6[%c0_6, %c0_7] : memref<1x384xf32, #tpu.memory_space<vmem>>, vector<1x384xf32>
    %11 = vector.broadcast %10 : vector<1x384xf32> to vector<64x384xf32>
    %12 = arith.addf %9, %11 : vector<64x384xf32>
    %c0_8 = arith.constant 0 : index
    %c0_9 = arith.constant 0 : index
    %13 = vector.load %arg11[%c0_8, %c0_9] : memref<64x384xf32, #tpu.memory_space<vmem>>, vector<64x384xf32>
    tpu.vector_store %arg11[%c0_8, %c0_9], %12 {strides = array<i32>} : memref<64x384xf32, #tpu.memory_space<vmem>>, vector<64x384xf32>,
    %c0_10 = arith.constant 0 : index
    %c0_11 = arith.constant 0 : index
    %14 = vector.load %arg5[%c0_10, %c0_11] : memref<128x384xf32, #tpu.memory_space<vmem>>, vector<128x384xf32>
    %c0_12 = arith.constant 0 : index
    %c0_13 = arith.constant 0 : index
    %15 = vector.load %arg7[%c0_12, %c0_13] : memref<1x128xf32, #tpu.memory_space<vmem>>, vector<1x128xf32>
    %c0_14 = arith.constant 0 : index
    %c0_15 = arith.constant 0 : index
    %16 = vector.load %arg3[%c0_14, %c0_15] : memref<8x128xf32, #tpu.memory_space<vmem>>, vector<8x128xf32>
    %c0_i32 = arith.constant 0 : i32
    %c8_i32 = arith.constant 8 : i32
    %17 = arith.muli %c0_i32, %c8_i32 : i32
    %18 = tpu.assume_multiple %17, 8 : i32
    %19 = arith.index_cast %18 : i32 to index
    %c0_16 = arith.constant 0 : index
    %20 = vector.load %arg11[%19, %c0_16] : memref<64x384xf32, #tpu.memory_space<vmem>>, vector<8x384xf32>
    %cst_17 = arith.constant dense<0.000000e+00> : vector<8x384xf32>
    %21 = tpu.matmul %16, %14, %cst_17 {dimension_numbers = #tpu.dot_dimension_numbers<[1], [0], [0], [1], [0, 0, 1, 1], [], []>} : vector<8x128xf32>, vector<128x384xf32>, vector<8x384xf32> -> vector<8x384xf32>
    %22 = vector.extract_strided_slice %20 {offsets = [0, 0], sizes = [8, 256], strides = [1, 1]} : vector<8x384xf32> to vector<8x256xf32>
    %23 = vector.extract_strided_slice %21 {offsets = [0, 0], sizes = [8, 256], strides = [1, 1]} : vector<8x384xf32> to vector<8x256xf32>
    %24 = arith.addf %22, %23 : vector<8x256xf32>
    %25 = arith.negf %24 : vector<8x256xf32>
    %26 = math.exp %25 : vector<8x256xf32>
    %cst_18 = arith.constant 1.000000e+00 : f32
    %27 = vector.broadcast %cst_18 : f32 to vector<8x256xf32>
    %28 = arith.addf %27, %26 : vector<8x256xf32>
    %29 = arith.divf %27, %28 : vector<8x256xf32>
    %30 = vector.extract_strided_slice %29 {offsets = [0, 0], sizes = [8, 128], strides = [1, 1]} : vector<8x256xf32> to vector<8x128xf32>
    %31 = vector.extract_strided_slice %29 {offsets = [0, 128], sizes = [8, 128], strides = [1, 1]} : vector<8x256xf32> to vector<8x128xf32>
    %32 = vector.extract_strided_slice %20 {offsets = [0, 256], sizes = [8, 128], strides = [1, 1]} : vector<8x384xf32> to vector<8x128xf32>
    %33 = vector.extract_strided_slice %21 {offsets = [0, 256], sizes = [8, 128], strides = [1, 1]} : vector<8x384xf32> to vector<8x128xf32>
    %34 = vector.broadcast %15 : vector<1x128xf32> to vector<8x128xf32>
    %35 = arith.addf %33, %34 : vector<8x128xf32>
    %36 = arith.mulf %30, %35 : vector<8x128xf32>
    %37 = arith.addf %32, %36 : vector<8x128xf32>
    %38 = math.tanh %37 : vector<8x128xf32>
    %39 = arith.subf %16, %38 : vector<8x128xf32>
    %40 = arith.mulf %31, %39 : vector<8x128xf32>
    %41 = arith.addf %38, %40 : vector<8x128xf32>
    %c1_i32 = arith.constant 1 : i32
    %c8_i32_19 = arith.constant 8 : i32
    %42 = arith.muli %c1_i32, %c8_i32_19 : i32
    %43 = tpu.assume_multiple %42, 8 : i32
    %44 = arith.index_cast %43 : i32 to index
    %c0_20 = arith.constant 0 : index
    %45 = vector.load %arg11[%44, %c0_20] : memref<64x384xf32, #tpu.memory_space<vmem>>, vector<8x384xf32>
    %cst_21 = arith.constant dense<0.000000e+00> : vector<8x384xf32>
    %46 = tpu.matmul %41, %14, %cst_21 {dimension_numbers = #tpu.dot_dimension_numbers<[1], [0], [0], [1], [0, 0, 1, 1], [], []>} : vector<8x128xf32>, vector<128x384xf32>, vector<8x384xf32> -> vector<8x384xf32>
    %47 = vector.extract_strided_slice %45 {offsets = [0, 0], sizes = [8, 256], strides = [1, 1]} : vector<8x384xf32> to vector<8x256xf32>
    %48 = vector.extract_strided_slice %46 {offsets = [0, 0], sizes = [8, 256], strides = [1, 1]} : vector<8x384xf32> to vector<8x256xf32>
    %49 = arith.addf %47, %48 : vector<8x256xf32>
    %50 = arith.negf %49 : vector<8x256xf32>
    %51 = math.exp %50 : vector<8x256xf32>
    %cst_22 = arith.constant 1.000000e+00 : f32
    %52 = vector.broadcast %cst_22 : f32 to vector<8x256xf32>
    %53 = arith.addf %52, %51 : vector<8x256xf32>
    %54 = arith.divf %52, %53 : vector<8x256xf32>
    %55 = vector.extract_strided_slice %54 {offsets = [0, 0], sizes = [8, 128], strides = [1, 1]} : vector<8x256xf32> to vector<8x128xf32>
    %56 = vector.extract_strided_slice %54 {offsets = [0, 128], sizes = [8, 128], strides = [1, 1]} : vector<8x256xf32> to vector<8x128xf32>
    %57 = vector.extract_strided_slice %45 {offsets = [0, 256], sizes = [8, 128], strides = [1, 1]} : vector<8x384xf32> to vector<8x128xf32>
    %58 = vector.extract_strided_slice %46 {offsets = [0, 256], sizes = [8, 128], strides = [1, 1]} : vector<8x384xf32> to vector<8x128xf32>
    %59 = vector.broadcast %15 : vector<1x128xf32> to vector<8x128xf32>
    %60 = arith.addf %58, %59 : vector<8x128xf32>
    %61 = arith.mulf %55, %60 : vector<8x128xf32>
    %62 = arith.addf %57, %61 : vector<8x128xf32>
    %63 = math.tanh %62 : vector<8x128xf32>
    %64 = arith.subf %41, %63 : vector<8x128xf32>
    %65 = arith.mulf %56, %64 : vector<8x128xf32>
    %66 = arith.addf %63, %65 : vector<8x128xf32>
    %c2_i32 = arith.constant 2 : i32
    %c8_i32_23 = arith.constant 8 : i32
    %67 = arith.muli %c2_i32, %c8_i32_23 : i32
    %68 = tpu.assume_multiple %67, 8 : i32
    %69 = arith.index_cast %68 : i32 to index
    %c0_24 = arith.constant 0 : index
    %70 = vector.load %arg11[%69, %c0_24] : memref<64x384xf32, #tpu.memory_space<vmem>>, vector<8x384xf32>
    %cst_25 = arith.constant dense<0.000000e+00> : vector<8x384xf32>
    %71 = tpu.matmul %66, %14, %cst_25 {dimension_numbers = #tpu.dot_dimension_numbers<[1], [0], [0], [1], [0, 0, 1, 1], [], []>} : vector<8x128xf32>, vector<128x384xf32>, vector<8x384xf32> -> vector<8x384xf32>
    %72 = vector.extract_strided_slice %70 {offsets = [0, 0], sizes = [8, 256], strides = [1, 1]} : vector<8x384xf32> to vector<8x256xf32>
    %73 = vector.extract_strided_slice %71 {offsets = [0, 0], sizes = [8, 256], strides = [1, 1]} : vector<8x384xf32> to vector<8x256xf32>
    %74 = arith.addf %72, %73 : vector<8x256xf32>
    %75 = arith.negf %74 : vector<8x256xf32>
    %76 = math.exp %75 : vector<8x256xf32>
    %cst_26 = arith.constant 1.000000e+00 : f32
    %77 = vector.broadcast %cst_26 : f32 to vector<8x256xf32>
    %78 = arith.addf %77, %76 : vector<8x256xf32>
    %79 = arith.divf %77, %78 : vector<8x256xf32>
    %80 = vector.extract_strided_slice %79 {offsets = [0, 0], sizes = [8, 128], strides = [1, 1]} : vector<8x256xf32> to vector<8x128xf32>
    %81 = vector.extract_strided_slice %79 {offsets = [0, 128], sizes = [8, 128], strides = [1, 1]} : vector<8x256xf32> to vector<8x128xf32>
    %82 = vector.extract_strided_slice %70 {offsets = [0, 256], sizes = [8, 128], strides = [1, 1]} : vector<8x384xf32> to vector<8x128xf32>
    %83 = vector.extract_strided_slice %71 {offsets = [0, 256], sizes = [8, 128], strides = [1, 1]} : vector<8x384xf32> to vector<8x128xf32>
    %84 = vector.broadcast %15 : vector<1x128xf32> to vector<8x128xf32>
    %85 = arith.addf %83, %84 : vector<8x128xf32>
    %86 = arith.mulf %80, %85 : vector<8x128xf32>
    %87 = arith.addf %82, %86 : vector<8x128xf32>
    %88 = math.tanh %87 : vector<8x128xf32>
    %89 = arith.subf %66, %88 : vector<8x128xf32>
    %90 = arith.mulf %81, %89 : vector<8x128xf32>
    %91 = arith.addf %88, %90 : vector<8x128xf32>
    %c3_i32 = arith.constant 3 : i32
    %c8_i32_27 = arith.constant 8 : i32
    %92 = arith.muli %c3_i32, %c8_i32_27 : i32
    %93 = tpu.assume_multiple %92, 8 : i32
    %94 = arith.index_cast %93 : i32 to index
    %c0_28 = arith.constant 0 : index
    %95 = vector.load %arg11[%94, %c0_28] : memref<64x384xf32, #tpu.memory_space<vmem>>, vector<8x384xf32>
    %cst_29 = arith.constant dense<0.000000e+00> : vector<8x384xf32>
    %96 = tpu.matmul %91, %14, %cst_29 {dimension_numbers = #tpu.dot_dimension_numbers<[1], [0], [0], [1], [0, 0, 1, 1], [], []>} : vector<8x128xf32>, vector<128x384xf32>, vector<8x384xf32> -> vector<8x384xf32>
    %97 = vector.extract_strided_slice %95 {offsets = [0, 0], sizes = [8, 256], strides = [1, 1]} : vector<8x384xf32> to vector<8x256xf32>
    %98 = vector.extract_strided_slice %96 {offsets = [0, 0], sizes = [8, 256], strides = [1, 1]} : vector<8x384xf32> to vector<8x256xf32>
    %99 = arith.addf %97, %98 : vector<8x256xf32>
    %100 = arith.negf %99 : vector<8x256xf32>
    %101 = math.exp %100 : vector<8x256xf32>
    %cst_30 = arith.constant 1.000000e+00 : f32
    %102 = vector.broadcast %cst_30 : f32 to vector<8x256xf32>
    %103 = arith.addf %102, %101 : vector<8x256xf32>
    %104 = arith.divf %102, %103 : vector<8x256xf32>
    %105 = vector.extract_strided_slice %104 {offsets = [0, 0], sizes = [8, 128], strides = [1, 1]} : vector<8x256xf32> to vector<8x128xf32>
    %106 = vector.extract_strided_slice %104 {offsets = [0, 128], sizes = [8, 128], strides = [1, 1]} : vector<8x256xf32> to vector<8x128xf32>
    %107 = vector.extract_strided_slice %95 {offsets = [0, 256], sizes = [8, 128], strides = [1, 1]} : vector<8x384xf32> to vector<8x128xf32>
    %108 = vector.extract_strided_slice %96 {offsets = [0, 256], sizes = [8, 128], strides = [1, 1]} : vector<8x384xf32> to vector<8x128xf32>
    %109 = vector.broadcast %15 : vector<1x128xf32> to vector<8x128xf32>
    %110 = arith.addf %108, %109 : vector<8x128xf32>
    %111 = arith.mulf %105, %110 : vector<8x128xf32>
    %112 = arith.addf %107, %111 : vector<8x128xf32>
    %113 = math.tanh %112 : vector<8x128xf32>
    %114 = arith.subf %91, %113 : vector<8x128xf32>
    %115 = arith.mulf %106, %114 : vector<8x128xf32>
    %116 = arith.addf %113, %115 : vector<8x128xf32>
    %c4_i32 = arith.constant 4 : i32
    %c8_i32_31 = arith.constant 8 : i32
    %117 = arith.muli %c4_i32, %c8_i32_31 : i32
    %118 = tpu.assume_multiple %117, 8 : i32
    %119 = arith.index_cast %118 : i32 to index
    %c0_32 = arith.constant 0 : index
    %120 = vector.load %arg11[%119, %c0_32] : memref<64x384xf32, #tpu.memory_space<vmem>>, vector<8x384xf32>
    %cst_33 = arith.constant dense<0.000000e+00> : vector<8x384xf32>
    %121 = tpu.matmul %116, %14, %cst_33 {dimension_numbers = #tpu.dot_dimension_numbers<[1], [0], [0], [1], [0, 0, 1, 1], [], []>} : vector<8x128xf32>, vector<128x384xf32>, vector<8x384xf32> -> vector<8x384xf32>
    %122 = vector.extract_strided_slice %120 {offsets = [0, 0], sizes = [8, 256], strides = [1, 1]} : vector<8x384xf32> to vector<8x256xf32>
    %123 = vector.extract_strided_slice %121 {offsets = [0, 0], sizes = [8, 256], strides = [1, 1]} : vector<8x384xf32> to vector<8x256xf32>
    %124 = arith.addf %122, %123 : vector<8x256xf32>
    %125 = arith.negf %124 : vector<8x256xf32>
    %126 = math.exp %125 : vector<8x256xf32>
    %cst_34 = arith.constant 1.000000e+00 : f32
    %127 = vector.broadcast %cst_34 : f32 to vector<8x256xf32>
    %128 = arith.addf %127, %126 : vector<8x256xf32>
    %129 = arith.divf %127, %128 : vector<8x256xf32>
    %130 = vector.extract_strided_slice %129 {offsets = [0, 0], sizes = [8, 128], strides = [1, 1]} : vector<8x256xf32> to vector<8x128xf32>
    %131 = vector.extract_strided_slice %129 {offsets = [0, 128], sizes = [8, 128], strides = [1, 1]} : vector<8x256xf32> to vector<8x128xf32>
    %132 = vector.extract_strided_slice %120 {offsets = [0, 256], sizes = [8, 128], strides = [1, 1]} : vector<8x384xf32> to vector<8x128xf32>
    %133 = vector.extract_strided_slice %121 {offsets = [0, 256], sizes = [8, 128], strides = [1, 1]} : vector<8x384xf32> to vector<8x128xf32>
    %134 = vector.broadcast %15 : vector<1x128xf32> to vector<8x128xf32>
    %135 = arith.addf %133, %134 : vector<8x128xf32>
    %136 = arith.mulf %130, %135 : vector<8x128xf32>
    %137 = arith.addf %132, %136 : vector<8x128xf32>
    %138 = math.tanh %137 : vector<8x128xf32>
    %139 = arith.subf %116, %138 : vector<8x128xf32>
    %140 = arith.mulf %131, %139 : vector<8x128xf32>
    %141 = arith.addf %138, %140 : vector<8x128xf32>
    %c5_i32 = arith.constant 5 : i32
    %c8_i32_35 = arith.constant 8 : i32
    %142 = arith.muli %c5_i32, %c8_i32_35 : i32
    %143 = tpu.assume_multiple %142, 8 : i32
    %144 = arith.index_cast %143 : i32 to index
    %c0_36 = arith.constant 0 : index
    %145 = vector.load %arg11[%144, %c0_36] : memref<64x384xf32, #tpu.memory_space<vmem>>, vector<8x384xf32>
    %cst_37 = arith.constant dense<0.000000e+00> : vector<8x384xf32>
    %146 = tpu.matmul %141, %14, %cst_37 {dimension_numbers = #tpu.dot_dimension_numbers<[1], [0], [0], [1], [0, 0, 1, 1], [], []>} : vector<8x128xf32>, vector<128x384xf32>, vector<8x384xf32> -> vector<8x384xf32>
    %147 = vector.extract_strided_slice %145 {offsets = [0, 0], sizes = [8, 256], strides = [1, 1]} : vector<8x384xf32> to vector<8x256xf32>
    %148 = vector.extract_strided_slice %146 {offsets = [0, 0], sizes = [8, 256], strides = [1, 1]} : vector<8x384xf32> to vector<8x256xf32>
    %149 = arith.addf %147, %148 : vector<8x256xf32>
    %150 = arith.negf %149 : vector<8x256xf32>
    %151 = math.exp %150 : vector<8x256xf32>
    %cst_38 = arith.constant 1.000000e+00 : f32
    %152 = vector.broadcast %cst_38 : f32 to vector<8x256xf32>
    %153 = arith.addf %152, %151 : vector<8x256xf32>
    %154 = arith.divf %152, %153 : vector<8x256xf32>
    %155 = vector.extract_strided_slice %154 {offsets = [0, 0], sizes = [8, 128], strides = [1, 1]} : vector<8x256xf32> to vector<8x128xf32>
    %156 = vector.extract_strided_slice %154 {offsets = [0, 128], sizes = [8, 128], strides = [1, 1]} : vector<8x256xf32> to vector<8x128xf32>
    %157 = vector.extract_strided_slice %145 {offsets = [0, 256], sizes = [8, 128], strides = [1, 1]} : vector<8x384xf32> to vector<8x128xf32>
    %158 = vector.extract_strided_slice %146 {offsets = [0, 256], sizes = [8, 128], strides = [1, 1]} : vector<8x384xf32> to vector<8x128xf32>
    %159 = vector.broadcast %15 : vector<1x128xf32> to vector<8x128xf32>
    %160 = arith.addf %158, %159 : vector<8x128xf32>
    %161 = arith.mulf %155, %160 : vector<8x128xf32>
    %162 = arith.addf %157, %161 : vector<8x128xf32>
    %163 = math.tanh %162 : vector<8x128xf32>
    %164 = arith.subf %141, %163 : vector<8x128xf32>
    %165 = arith.mulf %156, %164 : vector<8x128xf32>
    %166 = arith.addf %163, %165 : vector<8x128xf32>
    %c6_i32 = arith.constant 6 : i32
    %c8_i32_39 = arith.constant 8 : i32
    %167 = arith.muli %c6_i32, %c8_i32_39 : i32
    %168 = tpu.assume_multiple %167, 8 : i32
    %169 = arith.index_cast %168 : i32 to index
    %c0_40 = arith.constant 0 : index
    %170 = vector.load %arg11[%169, %c0_40] : memref<64x384xf32, #tpu.memory_space<vmem>>, vector<8x384xf32>
    %cst_41 = arith.constant dense<0.000000e+00> : vector<8x384xf32>
    %171 = tpu.matmul %166, %14, %cst_41 {dimension_numbers = #tpu.dot_dimension_numbers<[1], [0], [0], [1], [0, 0, 1, 1], [], []>} : vector<8x128xf32>, vector<128x384xf32>, vector<8x384xf32> -> vector<8x384xf32>
    %172 = vector.extract_strided_slice %170 {offsets = [0, 0], sizes = [8, 256], strides = [1, 1]} : vector<8x384xf32> to vector<8x256xf32>
    %173 = vector.extract_strided_slice %171 {offsets = [0, 0], sizes = [8, 256], strides = [1, 1]} : vector<8x384xf32> to vector<8x256xf32>
    %174 = arith.addf %172, %173 : vector<8x256xf32>
    %175 = arith.negf %174 : vector<8x256xf32>
    %176 = math.exp %175 : vector<8x256xf32>
    %cst_42 = arith.constant 1.000000e+00 : f32
    %177 = vector.broadcast %cst_42 : f32 to vector<8x256xf32>
    %178 = arith.addf %177, %176 : vector<8x256xf32>
    %179 = arith.divf %177, %178 : vector<8x256xf32>
    %180 = vector.extract_strided_slice %179 {offsets = [0, 0], sizes = [8, 128], strides = [1, 1]} : vector<8x256xf32> to vector<8x128xf32>
    %181 = vector.extract_strided_slice %179 {offsets = [0, 128], sizes = [8, 128], strides = [1, 1]} : vector<8x256xf32> to vector<8x128xf32>
    %182 = vector.extract_strided_slice %170 {offsets = [0, 256], sizes = [8, 128], strides = [1, 1]} : vector<8x384xf32> to vector<8x128xf32>
    %183 = vector.extract_strided_slice %171 {offsets = [0, 256], sizes = [8, 128], strides = [1, 1]} : vector<8x384xf32> to vector<8x128xf32>
    %184 = vector.broadcast %15 : vector<1x128xf32> to vector<8x128xf32>
    %185 = arith.addf %183, %184 : vector<8x128xf32>
    %186 = arith.mulf %180, %185 : vector<8x128xf32>
    %187 = arith.addf %182, %186 : vector<8x128xf32>
    %188 = math.tanh %187 : vector<8x128xf32>
    %189 = arith.subf %166, %188 : vector<8x128xf32>
    %190 = arith.mulf %181, %189 : vector<8x128xf32>
    %191 = arith.addf %188, %190 : vector<8x128xf32>
    %c7_i32 = arith.constant 7 : i32
    %c8_i32_43 = arith.constant 8 : i32
    %192 = arith.muli %c7_i32, %c8_i32_43 : i32
    %193 = tpu.assume_multiple %192, 8 : i32
    %194 = arith.index_cast %193 : i32 to index
    %c0_44 = arith.constant 0 : index
    %195 = vector.load %arg11[%194, %c0_44] : memref<64x384xf32, #tpu.memory_space<vmem>>, vector<8x384xf32>
    %cst_45 = arith.constant dense<0.000000e+00> : vector<8x384xf32>
    %196 = tpu.matmul %191, %14, %cst_45 {dimension_numbers = #tpu.dot_dimension_numbers<[1], [0], [0], [1], [0, 0, 1, 1], [], []>} : vector<8x128xf32>, vector<128x384xf32>, vector<8x384xf32> -> vector<8x384xf32>
    %197 = vector.extract_strided_slice %195 {offsets = [0, 0], sizes = [8, 256], strides = [1, 1]} : vector<8x384xf32> to vector<8x256xf32>
    %198 = vector.extract_strided_slice %196 {offsets = [0, 0], sizes = [8, 256], strides = [1, 1]} : vector<8x384xf32> to vector<8x256xf32>
    %199 = arith.addf %197, %198 : vector<8x256xf32>
    %200 = arith.negf %199 : vector<8x256xf32>
    %201 = math.exp %200 : vector<8x256xf32>
    %cst_46 = arith.constant 1.000000e+00 : f32
    %202 = vector.broadcast %cst_46 : f32 to vector<8x256xf32>
    %203 = arith.addf %202, %201 : vector<8x256xf32>
    %204 = arith.divf %202, %203 : vector<8x256xf32>
    %205 = vector.extract_strided_slice %204 {offsets = [0, 0], sizes = [8, 128], strides = [1, 1]} : vector<8x256xf32> to vector<8x128xf32>
    %206 = vector.extract_strided_slice %204 {offsets = [0, 128], sizes = [8, 128], strides = [1, 1]} : vector<8x256xf32> to vector<8x128xf32>
    %207 = vector.extract_strided_slice %195 {offsets = [0, 256], sizes = [8, 128], strides = [1, 1]} : vector<8x384xf32> to vector<8x128xf32>
    %208 = vector.extract_strided_slice %196 {offsets = [0, 256], sizes = [8, 128], strides = [1, 1]} : vector<8x384xf32> to vector<8x128xf32>
    %209 = vector.broadcast %15 : vector<1x128xf32> to vector<8x128xf32>
    %210 = arith.addf %208, %209 : vector<8x128xf32>
    %211 = arith.mulf %205, %210 : vector<8x128xf32>
    %212 = arith.addf %207, %211 : vector<8x128xf32>
    %213 = math.tanh %212 : vector<8x128xf32>
    %214 = arith.subf %191, %213 : vector<8x128xf32>
    %215 = arith.mulf %206, %214 : vector<8x128xf32>
    %216 = arith.addf %213, %215 : vector<8x128xf32>
    %c8_i32_47 = arith.constant 8 : i32
    %c0_48 = arith.constant 0 : index
    %c0_49 = arith.constant 0 : index
    %217 = vector.load %arg8[%c0_48, %c0_49] : memref<128x128xf32, #tpu.memory_space<vmem>>, vector<128x128xf32>
    %cst_50 = arith.constant dense<0.000000e+00> : vector<8x128xf32>
    %218 = tpu.matmul %216, %217, %cst_50 {dimension_numbers = #tpu.dot_dimension_numbers<[1], [0], [0], [1], [0, 0, 1, 1], [], []>} : vector<8x128xf32>, vector<128x128xf32>, vector<8x128xf32> -> vector<8x128xf32>
    %c0_51 = arith.constant 0 : index
    %c0_52 = arith.constant 0 : index
    %219 = vector.load %arg9[%c0_51, %c0_52] : memref<1x128xf32, #tpu.memory_space<vmem>>, vector<1x128xf32>
    %220 = vector.broadcast %219 : vector<1x128xf32> to vector<8x128xf32>
    %221 = arith.addf %218, %220 : vector<8x128xf32>
    %c0_53 = arith.constant 0 : index
    %c0_54 = arith.constant 0 : index
    %222 = vector.load %arg10[%c0_53, %c0_54] : memref<8x128xf32, #tpu.memory_space<vmem>>, vector<8x128xf32>
    tpu.vector_store %arg10[%c0_53, %c0_54], %221 {strides = array<i32>} : memref<8x128xf32, #tpu.memory_space<vmem>>, vector<8x128xf32>,
    return
  }
  func.func @transform_0(%arg0: i32) -> (i32, i32) {
    %c0_i32 = arith.constant 0 : i32
    %c0_i32_0 = arith.constant 0 : i32
    %c0_i32_1 = arith.constant 0 : i32
    return %c0_i32, %c0_i32_0 : i32, i32
  }
  func.func @transform_1(%arg0: i32) -> (i32, i32) {
    %c0_i32 = arith.constant 0 : i32
    %c0_i32_0 = arith.constant 0 : i32
    %c0_i32_1 = arith.constant 0 : i32
    return %c0_i32, %c0_i32_0 : i32, i32
  }
  func.func @transform_2(%arg0: i32) -> (i32, i32) {
    %c0_i32 = arith.constant 0 : i32
    %c0_i32_0 = arith.constant 0 : i32
    %c0_i32_1 = arith.constant 0 : i32
    return %c0_i32, %c0_i32_0 : i32, i32
  }
  func.func @transform_3(%arg0: i32) -> (i32, i32) {
    %c0_i32 = arith.constant 0 : i32
    %c0_i32_0 = arith.constant 0 : i32
    %c0_i32_1 = arith.constant 0 : i32
    return %c0_i32, %c0_i32_0 : i32, i32
  }
  func.func @transform_4(%arg0: i32) -> (i32, i32) {
    %c0_i32 = arith.constant 0 : i32
    %c0_i32_0 = arith.constant 0 : i32
    %c0_i32_1 = arith.constant 0 : i32
    return %c0_i32, %c0_i32_0 : i32, i32
  }
  func.func @transform_5(%arg0: i32) -> (i32, i32) {
    %c0_i32 = arith.constant 0 : i32
    %c0_i32_0 = arith.constant 0 : i32
    %c0_i32_1 = arith.constant 0 : i32
    return %c0_i32, %c0_i32_0 : i32, i32
  }
  func.func @transform_6(%arg0: i32) -> (i32, i32) {
    %c0_i32 = arith.constant 0 : i32
    %c0_i32_0 = arith.constant 0 : i32
    %c0_i32_1 = arith.constant 0 : i32
    return %c0_i32, %c0_i32_0 : i32, i32
  }
  func.func @transform_7(%arg0: i32) -> (i32, i32) {
    %c0_i32 = arith.constant 0 : i32
    %c0_i32_0 = arith.constant 0 : i32
    %c0_i32_1 = arith.constant 0 : i32
    return %c0_i32, %c0_i32_0 : i32, i32
  }
  func.func @transform_8(%arg0: i32) -> (i32, i32) {
    %c0_i32 = arith.constant 0 : i32
    %c0_i32_0 = arith.constant 0 : i32
    %c0_i32_1 = arith.constant 0 : i32
    return %c0_i32, %c0_i32_0 : i32, i32
  }
  func.func @transform_9(%arg0: i32) -> (i32, i32) {
    %c0_i32 = arith.constant 0 : i32
    %c0_i32_0 = arith.constant 0 : i32
    %c0_i32_1 = arith.constant 0 : i32
    return %c0_i32, %c0_i32_0 : i32, i32
  }
}

</mosaic_0001>

<bundles_post_ra>
// kernel: rnn_forward.1
= control target key start
LH: loop header
LB: loop body
LE: loop exit
PB: predicated region body
PF: predicated region fallthrough
CT: control target
= control target key end

     0   :  { %v2765_v0 = vmov 0   ;;  %v40_v32 = vlaneseq  ;;  %v2766_v36 = vmov 1.0   ;;  %vm240_vm8 = vcmask 261120   ;;  %s4168_s0 = inlined_call_operand.vmem [shape: s32[64,1], index: 0, kind: input, shape index: {}]   ;;  %s4169_s1 = inlined_call_operand.vmem [shape: f32[128,32], index: 1, kind: input, shape index: {}]   ;;  %s4170_s3 = inlined_call_operand.vmem [shape: f32[32,384], index: 3, kind: input, shape index: {}]   ;;  %s4171_s4 = inlined_call_operand.vmem [shape: f32[128,384], index: 4, kind: input, shape index: {}]   ;;  %s4172_s2 = inlined_call_operand.vmem [shape: f32[8,128], index: 2, kind: input, shape index: {}]   ;;  %s4173_s5 = inlined_call_operand.vmem [shape: f32[1,384], index: 5, kind: input, shape index: {}]   ;;  %s4174_s6 = inlined_call_operand.vmem [shape: f32[1,128], index: 6, kind: input, shape index: {}]   ;;  %s4175_s7 = inlined_call_operand.vmem [shape: f32[128,128], index: 7, kind: input, shape index: {}]   ;;  %s4176_s8 = inlined_call_operand.vmem [shape: f32[1,128], index: 8, kind: input, shape index: {}]   ;;  %s4177_s9 = inlined_call_operand.vmem [shape: f32[8,128], index: 9, kind: output, shape index: {}]  }
   0x1   :  { %2635 = vset.pattern.permute.xlu1 %v2765_v0  ;;  %2634 = vset.pattern.permute.xlu0 %v2765_v0  ;;  %v34_v1 = vld [vmem:[%s4168_s0 + $0x10] sm:$0xff]  ;;  %v32_v2 = vld [vmem:[%s4168_s0] sm:$0xff]  ;;  %v35_v3 = vld [vmem:[%s4168_s0 + $0x18] sm:$0xff]  ;;  %vm2768_vm9 = vmmov 0  }
   0x2   :  { %49 = vperm.xlu1 %2635, %v34_v1   ;;  %43 = vperm.xlu0 %2634, %v32_v2   ;;  %v33_v4 = vld [vmem:[%s4168_s0 + $0x8] sm:$0xff]  ;;  %v105_v5 = vld [vmem:[%s4169_s1 + $0x78] sm:$0xff]  ;;  %v104_v6 = vld [vmem:[%s4169_s1 + $0x70] sm:$0xff]  ;;  %v41_v33 = vand.u32 127, %v40_v32 }
   0x3   :  { %2251 = vmatprep.subr.mxu0 %v105_v5  ;;  %v103_v7 = vld [vmem:[%s4169_s1 + $0x68] sm:$0xff]  ;;  %v36_v9 = vld [vmem:[%s4168_s0 + $0x20] sm:$0xff]  ;;  %v39_v11 = vld [vmem:[%s4168_s0 + $0x38] sm:$0xff] }
   0x4   :  { %2252 = vmatpush3.msra.mxu0 %v105_v5  ;;  %v37_v8 = vld [vmem:[%s4168_s0 + $0x28] sm:$0xff]  ;;  %v102_v10 = vld [vmem:[%s4169_s1 + $0x60] sm:$0xff]  ;;  %v38_v12 = vld [vmem:[%s4168_s0 + $0x30] sm:$0xff] }
   0x5   :  { %2253 = vmatprep.subr.mxu0 %v104_v6  ;;  %v101_v13 = vld [vmem:[%s4169_s1 + $0x58] sm:$0xff]  ;;  %v100_v14 = vld [vmem:[%s4169_s1 + $0x50] sm:$0xff]  ;;  %v99_v15 = vld [vmem:[%s4169_s1 + $0x48] sm:$0xff] }
   0x6   :  { %52 = vperm.xlu1 %2635, %v35_v3   ;;  %46 = vperm.xlu0 %2634, %v33_v4   ;;  %v98_v16 = vld [vmem:[%s4169_s1 + $0x40] sm:$0xff]  ;;  %v97_v17 = vld [vmem:[%s4169_s1 + $0x38] sm:$0xff]  ;;  %v96_v18 = vld [vmem:[%s4169_s1 + $0x30] sm:$0xff] }
   0x7   :  { %2254 = vmatpush3.msra.mxu0 %v104_v6  ;;  %v95_v19 = vld [vmem:[%s4169_s1 + $0x28] sm:$0xff]  ;;  %v221_v20 = vld [vmem:[%s4170_s3 + $0x50] sm:$0xff]  ;;  %v218_v22 = vld [vmem:[%s4170_s3 + $0x38] sm:$0xff] }
   0x8   :  { %2255 = vmatprep.subr.mxu0 %v103_v7  ;;  %v220_v21 = vld [vmem:[%s4170_s3 + $0x48] sm:$0xff]  ;;  %289 = vmatprep.subr.mxu1 %v221_v20  ;;  %v94_v23 = vld [vmem:[%s4169_s1 + $0x20] sm:$0xff]  ;;  %v217_v24 = vld [vmem:[%s4170_s3 + $0x30] sm:$0xff] }
   0x9   :  { %2256 = vmatpush3.msra.mxu0 %v103_v7  ;;  %290 = vmatpush1.msra.mxu1 %v220_v21  ;;  %v215_v25 = vld [vmem:[%s4170_s3 + $0x20] sm:$0xff]  ;;  %v93_v26 = vld [vmem:[%s4169_s1 + $0x18] sm:$0xff]  ;;  %v92_v28 = vld [vmem:[%s4169_s1 + $0x10] sm:$0xff] }
   0xa   :  { %58 = vperm.xlu1 %2635, %v37_v8   ;;  %55 = vperm.xlu0 %2634, %v36_v9   ;;  %v214_v27 = vld [vmem:[%s4170_s3 + $0x18] sm:$0xff]  ;;  %v91_v29 = vld [vmem:[%s4169_s1 + $0x8] sm:$0xff]  ;;  %v90_v30 = vld [vmem:[%s4169_s1] sm:$0xff] }
   0xb   :  { %2257 = vmatprep.subr.mxu0 %v102_v10  ;;  %291 = vmatprep.subr.mxu1 %v218_v22  ;;  %v2912_v31 = vld [vmem:[%s4171_s4 + $0x170] sm:$0xff]  ;;  %v2919_v39 = vld [vmem:[%s4171_s4 + $0x168] sm:$0xff]  ;;  %v2924_v40 = vld [vmem:[%s4171_s4 + $0x158] sm:$0xff] }
   0xc   :  { %2258 = vmatpush3.msra.mxu0 %v102_v10  ;;  %292 = vmatpush1.msra.mxu1 %v217_v24  ;;  %4201 = vst [vmem:[#allocation3_spill] sm:$0xff] %v2912_v31  ;;  %v2929_v41 = vld [vmem:[%s4171_s4 + $0x150] sm:$0xff]  ;;  %v2935_v42 = vld [vmem:[%s4171_s4 + $0x140] sm:$0xff]  ;;  %v2941_v45 = vld [vmem:[%s4171_s4 + $0x138] sm:$0xff]  ;;  %v4178_v10 = vmov 0.0  }
   0xd   :  { %2259 = vmatprep.subr.mxu0 %v101_v13  ;;  %293 = vmatprep.subr.mxu1 %v215_v25  ;;  %v2947_v46 = vld [vmem:[%s4171_s4 + $0x128] sm:$0xff]  ;;  %v2953_v47 = vld [vmem:[%s4171_s4 + $0x120] sm:$0xff]  ;;  %v2959_v48 = vld [vmem:[%s4171_s4 + $0x110] sm:$0xff] }
   0xe   :  { %64 = vperm.xlu1 %2635, %v39_v11   ;;  %61 = vperm.xlu0 %2634, %v38_v12   ;;  %v2965_v50 = vld [vmem:[%s4171_s4 + $0x108] sm:$0xff]  ;;  %v2971_v51 = vld [vmem:[%s4171_s4 + $0xf8] sm:$0xff]  ;;  %v2977_v53 = vld [vmem:[%s4171_s4 + $0xf0] sm:$0xff] }
   0xf   :  { %2260 = vmatpush3.msra.mxu0 %v101_v13  ;;  %294 = vmatpush1.msra.mxu1 %v214_v27  ;;  %v2983_v54 = vld [vmem:[%s4171_s4 + $0xe0] sm:$0xff]  ;;  %v2989_v55 = vld [vmem:[%s4171_s4 + $0xd8] sm:$0xff]  ;;  %v2995_v56 = vld [vmem:[%s4171_s4 + $0xc8] sm:$0xff] }
  0x10   :  { %2261 = vmatprep.subr.mxu0 %v100_v14  ;;  %v3001_v57 = vld [vmem:[%s4171_s4 + $0xc0] sm:$0xff]  ;;  %v3007_v58 = vld [vmem:[%s4171_s4 + $0xb0] sm:$0xff]  ;;  %v3013_v59 = vld [vmem:[%s4171_s4 + $0xa8] sm:$0xff]  ;;  %329 = vmatprep.mubr.f32.mxu1 %v4178_v10 }
  0x11   :  { %2262 = vmatpush3.msra.mxu0 %v100_v14  ;;  %v3019_v60 = vld [vmem:[%s4171_s4 + $0x98] sm:$0xff]  ;;  %v3025_v61 = vld [vmem:[%s4171_s4 + $0x90] sm:$0xff]  ;;  %v3031_v62 = vld [vmem:[%s4171_s4 + $0x80] sm:$0xff] }
  0x12   :  { %2263 = vmatprep.subr.mxu0 %v99_v15  ;;  %v3037_v63 = vld [vmem:[%s4171_s4 + $0x78] sm:$0xff]  ;;  %v3043_v0 = vld [vmem:[%s4171_s4 + $0x68] sm:$0xff]  ;;  %v3049_v1 = vld [vmem:[%s4171_s4 + $0x60] sm:$0xff] }
  0x13   :  { %2264 = vmatpush3.msra.mxu0 %v99_v15  ;;  %v3055_v2 = vld [vmem:[%s4171_s4 + $0x50] sm:$0xff]  ;;  %v3061_v3 = vld [vmem:[%s4171_s4 + $0x48] sm:$0xff]  ;;  %v3067_v4 = vld [vmem:[%s4171_s4 + $0x38] sm:$0xff] }
  0x14   :  { %2265 = vmatprep.subr.mxu0 %v98_v16  ;;  %v3075_v5 = vld [vmem:[%s4171_s4 + $0x30] sm:$0xff]  ;;  %v212_v6 = vld [vmem:[%s4170_s3 + $0x8] sm:$0xff]  ;;  %v211_v7 = vld [vmem:[%s4170_s3] sm:$0xff] }
  0x15   :  { %2266 = vmatpush3.msra.mxu0 %v98_v16  ;;  %v3087_v8 = vld [vmem:[%s4171_s4 + $0x20] sm:$0xff]  ;;  %295 = vmatprep.subr.mxu1 %v212_v6  ;;  %v3093_v9 = vld [vmem:[%s4171_s4 + $0x18] sm:$0xff]  ;;  %v3102_v12 = vld [vmem:[%s4171_s4 + $0x8] sm:$0xff] }
  0x16   :  { %2267 = vmatprep.subr.mxu0 %v97_v17  ;;  %4202 = vst [vmem:[#allocation4_spill] sm:$0xff] %v3087_v8  ;;  %4203 = vst [vmem:[#allocation5_spill] sm:$0xff] %v3093_v9  ;;  %296 = vmatpush1.msra.mxu1 %v211_v7  ;;  %v222_v11 = vld [vmem:[%s4170_s3 + $0x58] sm:$0xff]  ;;  %v3108_v13 = vld [vmem:[%s4171_s4] sm:$0xff]  ;;  %v226_v7 = vshrl.u32 %v40_v32, 7 }
  0x17   :  { %2268 = vmatpush3.msra.mxu0 %v97_v17  ;;  %4204 = vst [vmem:[#allocation6_spill] sm:$0xff] %v3102_v12  ;;  %2295 = vmatprep.subr.mxu1 %v222_v11  ;;  %4205 = vst [vmem:[#allocation7_spill] sm:$0xff] %v3108_v13  ;;  %v3115_v14 = vld [vmem:[%s4172_s2] sm:$0xff]  ;;  %v213_v20 = vld [vmem:[%s4170_s3 + $0x10] sm:$0xff] }
  0x18   :  { %2269 = vmatprep.subr.mxu0 %v96_v18  ;;  %v219_v17 = vld [vmem:[%s4170_s3 + $0x40] sm:$0xff]  ;;  %v3294_v6 = vld [vmem:[%s4171_s4 + $0x10] sm:$0xff] }
  0x19   :  { %2270 = vmatpush3.msra.mxu0 %v96_v18  ;;  %v216_v18 = vld [vmem:[%s4170_s3 + $0x28] sm:$0xff]  ;;  %v3188_v27 = vld [vmem:[%s4171_s4 + $0x160] sm:$0xff]  ;;  %4207 = vst [vmem:[#allocation9_spill] sm:$0xff] %v3294_v6 }
  0x1a   :  { %2271 = vmatprep.subr.mxu0 %v95_v19 }
  0x1b   :  { %2272 = vmatpush3.msra.mxu0 %v95_v19 }
  0x1c   :  { %2273 = vmatprep.subr.mxu0 %v94_v23 }
  0x1d   :  { %2274 = vmatpush3.msra.mxu0 %v94_v23 }
  0x1e   :  { %2275 = vmatprep.subr.mxu0 %v93_v26 }
  0x1f   :  { %2276 = vmatpush3.msra.mxu0 %v93_v26  ;;  %v3182_v26 = vld [vmem:[%s4171_s4 + $0x178] sm:$0xff] }
  0x20   :  { %2277 = vmatprep.subr.mxu0 %v92_v28 }
  0x21   :  { %2278 = vmatpush3.msra.mxu0 %v92_v28  ;;  %v3196_v28 = vld [vmem:[%s4171_s4 + $0x148] sm:$0xff] }
  0x22   :  { %2279 = vmatprep.subr.mxu0 %v91_v29 }
  0x23   :  { %2280 = vmatpush3.msra.mxu0 %v91_v29  ;;  %v3204_v29 = vld [vmem:[%s4171_s4 + $0x130] sm:$0xff] }
  0x24   :  { %2281 = vmatprep.subr.mxu0 %v90_v30 }
  0x25   :  { %2282 = vmatpush3.msra.mxu0 %v90_v30  ;;  %v3212_v30 = vld [vmem:[%s4171_s4 + $0x118] sm:$0xff] }
  0x26   :  { %563 = vmatprep.subr.mxu0 %v2912_v31 }
  0x7d   :  { %v50_v34 = vpop.permute.xlu1 %49  ;;  %v44_v35 = vpop.permute.xlu0 %43 }
  0x7e   :  { %vm66_vm0 = vcmp.eq.s32.totalorder %v44_v35, %v41_v33  ;;  %vm68_vm1 = vcmp.eq.s32.totalorder %v50_v34, %v41_v33  ;;  %v3228_v34 = vld [vmem:[%s4171_s4 + $0xe8] sm:$0xff]  ;;  %v3236_v35 = vld [vmem:[%s4171_s4 + $0xd0] sm:$0xff] }
  0x7f   :  { %2283 = vmatprep.mubr.msk.f32.mxu0 %vm66_vm0, %v2766_v36 }
  0x81   :  { %v53_v37 = vpop.permute.xlu1 %52  ;;  %v47_v38 = vpop.permute.xlu0 %46 }
  0x82   :  { %vm67_vm2 = vcmp.eq.s32.totalorder %v47_v38, %v41_v33  ;;  %vm69_vm3 = vcmp.eq.s32.totalorder %v53_v37, %v41_v33  ;;  %v3252_v37 = vld [vmem:[%s4171_s4 + $0xa0] sm:$0xff]  ;;  %v3259_v38 = vld [vmem:[%s4171_s4 + $0x88] sm:$0xff] }
  0x83   :  { %2284 = vmatmul.mubr.msk.f32.vlgmr.msra.gmra.mxu0 %vm67_vm2, %v2766_v36 }
  0x84   :  { %2286 = vmatprep.mubr.msk.f32.mxu0 %vm68_vm1, %v2766_v36  ;;  %564 = vmatpush1.msra.mxu0 %v2919_v39 }
  0x85   :  { %v59_v43 = vpop.permute.xlu1 %58  ;;  %v56_v44 = vpop.permute.xlu0 %55  ;;  %565 = vmatprep.subr.mxu0 %v2924_v40 }
  0x86   :  { %vm70_vm4 = vcmp.eq.s32.totalorder %v56_v44, %v41_v33  ;;  %566 = vmatpush1.msra.mxu0 %v2929_v41  ;;  %vm71_vm5 = vcmp.eq.s32.totalorder %v59_v43, %v41_v33  ;;  %v3266_v43 = vld [vmem:[%s4171_s4 + $0x70] sm:$0xff]  ;;  %v3273_v44 = vld [vmem:[%s4171_s4 + $0x58] sm:$0xff] }
  0x87   :  { %2287 = vmatmul.mubr.msk.f32.gmra.mxu0 %vm69_vm3, %v2766_v36  ;;  %567 = vmatprep.subr.mxu0 %v2935_v42 }
  0x88   :  { %2289 = vmatprep.mubr.msk.f32.mxu0 %vm70_vm4, %v2766_v36  ;;  %568 = vmatpush1.msra.mxu0 %v2941_v45 }
  0x89   :  { %v62_v49 = vpop.permute.xlu0 %61  ;;  %569 = vmatprep.subr.mxu0 %v2947_v46  ;;  %v65_v52 = vpop.permute.xlu1 %64 }
  0x8a   :  { %vm72_vm6 = vcmp.eq.s32.totalorder %v62_v49, %v41_v33  ;;  %570 = vmatpush1.msra.mxu0 %v2953_v47  ;;  %vm73_vm7 = vcmp.eq.s32.totalorder %v65_v52, %v41_v33  ;;  %v3220_v33 = vld [vmem:[%s4171_s4 + $0x100] sm:$0xff]  ;;  %v3287_v52 = vld [vmem:[%s4171_s4 + $0x28] sm:$0xff] }
  0x8b   :  { %2290 = vmatmul.mubr.msk.f32.gmra.mxu0 %vm71_vm5, %v2766_v36  ;;  %571 = vmatprep.subr.mxu0 %v2959_v48  ;;  %v3280_v49 = vld [vmem:[%s4171_s4 + $0x40] sm:$0xff]  ;;  %4206 = vst [vmem:[#allocation8_spill] sm:$0xff] %v3287_v52 }
  0x8c   :  { %2292 = vmatprep.mubr.msk.f32.mxu0 %vm72_vm6, %v2766_v36  ;;  %572 = vmatpush1.msra.mxu0 %v2965_v50 }
  0x8d   :  { %573 = vmatprep.subr.mxu0 %v2971_v51 }
  0x8e   :  { %574 = vmatpush1.msra.mxu0 %v2977_v53 }
  0x8f   :  { %2293 = vmatmul.mubr.msk.f32.gmra.mxu0 %vm73_vm7, %v2766_v36  ;;  %575 = vmatprep.subr.mxu0 %v2983_v54  ;;  %v3245_v36 = vld [vmem:[%s4171_s4 + $0xb8] sm:$0xff] }
  0x90   :  { %576 = vmatpush1.msra.mxu0 %v2989_v55  ;;  %627 = vmatprep.mubr.f32.mxu0 %v4178_v10 }
  0x91   :  { %577 = vmatprep.subr.mxu0 %v2995_v56 }
  0x92   :  { %578 = vmatpush1.msra.mxu0 %v3001_v57 }
  0x93   :  { %579 = vmatprep.subr.mxu0 %v3007_v58 }
  0x94   :  { %580 = vmatpush1.msra.mxu0 %v3013_v59 }
  0x95   :  { %581 = vmatprep.subr.mxu0 %v3019_v60 }
  0x96   :  { %582 = vmatpush1.msra.mxu0 %v3025_v61 }
  0x97   :  { %583 = vmatprep.subr.mxu0 %v3031_v62 }
  0x98   :  { %584 = vmatpush1.msra.mxu0 %v3037_v63 }
  0x99   :  { %585 = vmatprep.subr.mxu0 %v3043_v0 }
  0x9a   :  { %586 = vmatpush1.msra.mxu0 %v3049_v1 }
  0x9b   :  { %587 = vmatprep.subr.mxu0 %v3055_v2 }
  0x9c   :  { %588 = vmatpush1.msra.mxu0 %v3061_v3 }
  0x9d   :  { %589 = vmatprep.subr.mxu0 %v3067_v4 }
  0x9e   :  { %590 = vmatpush1.msra.mxu0 %v3075_v5 }
  0x9f   :  { %591 = vmatprep.subr.mxu0 %v3087_v8 }
  0xa0   :  { %592 = vmatpush1.msra.mxu0 %v3093_v9 }
  0xa1   :  { %593 = vmatprep.subr.mxu0 %v3102_v12 }
  0xa2   :  { %594 = vmatpush1.msra.mxu0 %v3108_v13 }
  0xa3   :  { %628 = vmatmul.mubr.f32.vlgmr.msra.gmra.mxu0 %v3115_v14  ;;  %737 = vmatprep.subr.mxu0 %v2912_v31 }
  0xa4   :  { %738 = vmatpush1.msra.mxu0 %v2919_v39  ;;  %801 = vmatprep.mubr.f32.mxu0 %v4178_v10 }
  0xa5   :  { %739 = vmatprep.subr.mxu0 %v2924_v40 }
  0xa6   :  { %740 = vmatpush1.msra.mxu0 %v2929_v41 }
  0xa7   :  { %741 = vmatprep.subr.mxu0 %v2935_v42 }
  0xa8   :  { %742 = vmatpush1.msra.mxu0 %v2941_v45 }
  0xa9   :  { %743 = vmatprep.subr.mxu0 %v2947_v46 }
  0xaa   :  { %744 = vmatpush1.msra.mxu0 %v2953_v47 }
  0xab   :  { %745 = vmatprep.subr.mxu0 %v2959_v48 }
  0xac   :  { %746 = vmatpush1.msra.mxu0 %v2965_v50 }
  0xad   :  { %747 = vmatprep.subr.mxu0 %v2971_v51 }
  0xae   :  { %748 = vmatpush1.msra.mxu0 %v2977_v53 }
  0xaf   :  { %749 = vmatprep.subr.mxu0 %v2983_v54 }
  0xb0   :  { %750 = vmatpush1.msra.mxu0 %v2989_v55 }
  0xb1   :  { %751 = vmatprep.subr.mxu0 %v2995_v56 }
  0xb2   :  { %752 = vmatpush1.msra.mxu0 %v3001_v57 }
  0xb3   :  { %753 = vmatprep.subr.mxu0 %v3007_v58 }
  0xb4   :  { %754 = vmatpush1.msra.mxu0 %v3013_v59 }
  0xb5   :  { %755 = vmatprep.subr.mxu0 %v3019_v60 }
  0xb6   :  { %756 = vmatpush1.msra.mxu0 %v3025_v61 }
  0xb7   :  { %757 = vmatprep.subr.mxu0 %v3031_v62 }
  0xb8   :  { %758 = vmatpush1.msra.mxu0 %v3037_v63 }
  0xb9   :  { %759 = vmatprep.subr.mxu0 %v3043_v0 }
  0xba   :  { %760 = vmatpush1.msra.mxu0 %v3049_v1 }
  0xbb   :  { %761 = vmatprep.subr.mxu0 %v3055_v2 }
  0xbc   :  { %762 = vmatpush1.msra.mxu0 %v3061_v3 }
  0xbd   :  { %763 = vmatprep.subr.mxu0 %v3067_v4 }
  0xbe   :  { %764 = vmatpush1.msra.mxu0 %v3075_v5 }
  0xbf   :  { %765 = vmatprep.subr.mxu0 %v3087_v8 }
  0xc0   :  { %766 = vmatpush1.msra.mxu0 %v3093_v9 }
  0xc1   :  { %767 = vmatprep.subr.mxu0 %v3102_v12 }
  0xc2   :  { %768 = vmatpush1.msra.mxu0 %v3108_v13 }
  0xc3   :  { %905 = vmatprep.subr.mxu0 %v2912_v31 }
 0x143   :  { %v2285_v15 = vpop.f32.mrf.mxu0 }
 0x145   :  { %v172_v16 = vpop.f32.mrf.mxu0 }
 0x146   :  { %2028 = vmatmul.mubr.msk.f32.vlgmr.msra.gmra.mxu1 %vm240_vm8, %v172_v16 }
 0x147   :  { %2296 = vmatpush3.msra.mxu1 %v222_v11  ;;  %335 = vmatprep.mubr.f32.mxu1 %v4178_v10  ;;  %v2288_v19 = vpop.f32.mrf.mxu0  ;;  %v227_v11 = vsub.s32 0, %v226_v7 }
 0x148   :  { %2297 = vmatprep.subr.mxu1 %v219_v17 }
 0x149   :  { %2298 = vmatpush3.msra.mxu1 %v219_v17  ;;  %v182_v21 = vpop.f32.mrf.mxu0  ;;  %v231_v17 = vsub.s32 1, %v226_v7 }
 0x14a   :  { %2029 = vmatmul.mubr.msk.f32.gmra.mxu1 %vm240_vm8, %v2285_v15  ;;  %2299 = vmatprep.subr.mxu1 %v216_v18 }
 0x14b   :  { %341 = vmatprep.mubr.f32.mxu1 %v4178_v10  ;;  %2300 = vmatpush3.msra.mxu1 %v216_v18  ;;  %v2291_v22 = vpop.f32.mrf.mxu0 }
 0x14c   :  { %2301 = vmatprep.subr.mxu1 %v213_v20 }
 0x14d   :  { %2302 = vmatpush3.msra.mxu1 %v213_v20  ;;  %v192_v23 = vpop.f32.mrf.mxu0 }
 0x14e   :  { %2030 = vmatmul.mubr.msk.f32.gmra.mxu1 %vm240_vm8, %v182_v21  ;;  %2315 = vmatprep.subr.mxu1 %v4178_v10 }
 0x14f   :  { %347 = vmatprep.mubr.f32.mxu1 %v4178_v10  ;;  %v2294_v24 = vpop.f32.mrf.mxu0 }
 0x151   :  { %v202_v25 = vpop.f32.mrf.mxu0 }
 0x152   :  { %2031 = vmatmul.mubr.msk.f32.gmra.mxu1 %vm240_vm8, %v2288_v19 }
 0x153   :  { %353 = vmatprep.mubr.f32.mxu1 %v4178_v10 }
 0x156   :  { %2032 = vmatmul.mubr.msk.f32.gmra.mxu1 %vm240_vm8, %v192_v23 }
 0x157   :  { %359 = vmatprep.mubr.f32.mxu1 %v4178_v10 }
 0x15a   :  { %2033 = vmatmul.mubr.msk.f32.gmra.mxu1 %vm240_vm8, %v2291_v22 }
 0x15b   :  { %365 = vmatprep.mubr.f32.mxu1 %v4178_v10 }
 0x15e   :  { %2034 = vmatmul.mubr.msk.f32.gmra.mxu1 %vm240_vm8, %v202_v25 }
 0x15f   :  { %371 = vmatprep.mubr.f32.mxu1 %v4178_v10 }
 0x162   :  { %2035 = vmatmul.mubr.msk.f32.gmra.mxu1 %vm240_vm8, %v2294_v24 }
 0x163   :  { %2303 = vmatprep.mubr.msk.f32.mxu1 %vm240_vm8, %v172_v16 }
 0x166   :  { %2304 = vmatmul.mubr.msk.f32.vlgmr.msra.gmra.mxu1 %vm240_vm8, %v2285_v15  ;;  %v223_v15 = vld [vmem:[%s4173_s5] sm:$0x7] }
 0x167   :  { %2316 = vmatpush3.msra.mxu1 %v3182_v26  ;;  %2306 = vmatprep.mubr.msk.f32.mxu1 %vm240_vm8, %v182_v21  ;;  %v232_v21 = vrot.slane %v223_v15, %v231_v17 }
 0x168   :  { %2317 = vmatprep.subr.mxu1 %v4178_v10 }
 0x169   :  { %2318 = vmatpush3.msra.mxu1 %v3188_v27 }
 0x16a   :  { %2319 = vmatprep.subr.mxu1 %v4178_v10  ;;  %2307 = vmatmul.mubr.msk.f32.gmra.mxu1 %vm240_vm8, %v2288_v19  ;;  %v228_v19 = vrot.slane %v223_v15, %v227_v11 }
 0x16b   :  { %2320 = vmatpush3.msra.mxu1 %v3196_v28  ;;  %2309 = vmatprep.mubr.msk.f32.mxu1 %vm240_vm8, %v192_v23 }
 0x16c   :  { %2321 = vmatprep.subr.mxu1 %v4178_v10 }
 0x16d   :  { %2322 = vmatpush3.msra.mxu1 %v3204_v29 }
 0x16e   :  { %2323 = vmatprep.subr.mxu1 %v4178_v10  ;;  %2310 = vmatmul.mubr.msk.f32.gmra.mxu1 %vm240_vm8, %v2291_v22 }
 0x16f   :  { %2324 = vmatpush3.msra.mxu1 %v3212_v30  ;;  %2312 = vmatprep.mubr.msk.f32.mxu1 %vm240_vm8, %v202_v25 }
 0x170   :  { %2325 = vmatprep.subr.mxu1 %v4178_v10 }
 0x171   :  { %2326 = vmatpush3.msra.mxu1 %v3220_v33 }
 0x172   :  { %2327 = vmatprep.subr.mxu1 %v4178_v10  ;;  %2313 = vmatmul.mubr.msk.f32.gmra.mxu1 %vm240_vm8, %v2294_v24 }
 0x173   :  { %2328 = vmatpush3.msra.mxu1 %v3228_v34  ;;  %2347 = vmatprep.mubr.msk.f32.mxu1 %vm2768_vm9, %v4178_v10 }
 0x174   :  { %2329 = vmatprep.subr.mxu1 %v4178_v10 }
 0x175   :  { %2330 = vmatpush3.msra.mxu1 %v3236_v35 }
 0x176   :  { %2331 = vmatprep.subr.mxu1 %v4178_v10 }
 0x177   :  { %2332 = vmatpush3.msra.mxu1 %v3245_v36 }
 0x178   :  { %2333 = vmatprep.subr.mxu1 %v4178_v10 }
 0x179   :  { %2334 = vmatpush3.msra.mxu1 %v3252_v37 }
 0x17a   :  { %2335 = vmatprep.subr.mxu1 %v4178_v10 }
 0x17b   :  { %2336 = vmatpush3.msra.mxu1 %v3259_v38 }
 0x17c   :  { %2337 = vmatprep.subr.mxu1 %v4178_v10 }
 0x17d   :  { %2338 = vmatpush3.msra.mxu1 %v3266_v43 }
 0x17e   :  { %2339 = vmatprep.subr.mxu1 %v4178_v10 }
 0x17f   :  { %2340 = vmatpush3.msra.mxu1 %v3273_v44 }
 0x180   :  { %2341 = vmatprep.subr.mxu1 %v4178_v10 }
 0x181   :  { %2342 = vmatpush3.msra.mxu1 %v3280_v49 }
 0x182   :  { %2343 = vmatprep.subr.mxu1 %v4178_v10 }
 0x183   :  { %2344 = vmatpush3.msra.mxu1 %v3287_v52 }
 0x184   :  { %2345 = vmatprep.subr.mxu1 %v4178_v10 }
 0x185   :  { %2346 = vmatpush3.msra.mxu1 %v3294_v6 }
 0x186   :  { %2348 = vmatmul.mubr.f32.vlgmr.msra.gmra.mxu1 %v3115_v14  ;;  %2350 = vmatprep.subr.mxu1 %v4178_v10 }
 0x187   :  { %2351 = vmatpush3.msra.mxu1 %v3182_v26  ;;  %2382 = vmatprep.mubr.msk.f32.mxu1 %vm2768_vm9, %v4178_v10 }
 0x188   :  { %2352 = vmatprep.subr.mxu1 %v4178_v10 }
 0x189   :  { %2353 = vmatpush3.msra.mxu1 %v3188_v27 }
 0x18a   :  { %2354 = vmatprep.subr.mxu1 %v4178_v10 }
 0x18b   :  { %2355 = vmatpush3.msra.mxu1 %v3196_v28 }
 0x18c   :  { %2356 = vmatprep.subr.mxu1 %v4178_v10 }
 0x18d   :  { %2357 = vmatpush3.msra.mxu1 %v3204_v29 }
 0x18e   :  { %2358 = vmatprep.subr.mxu1 %v4178_v10 }
 0x18f   :  { %2359 = vmatpush3.msra.mxu1 %v3212_v30 }
 0x190   :  { %2360 = vmatprep.subr.mxu1 %v4178_v10 }
 0x191   :  { %2361 = vmatpush3.msra.mxu1 %v3220_v33 }
 0x192   :  { %2362 = vmatprep.subr.mxu1 %v4178_v10 }
 0x193   :  { %2363 = vmatpush3.msra.mxu1 %v3228_v34 }
 0x194   :  { %2364 = vmatprep.subr.mxu1 %v4178_v10 }
 0x195   :  { %2365 = vmatpush3.msra.mxu1 %v3236_v35 }
 0x196   :  { %2366 = vmatprep.subr.mxu1 %v4178_v10 }
 0x197   :  { %2367 = vmatpush3.msra.mxu1 %v3245_v36 }
 0x198   :  { %2368 = vmatprep.subr.mxu1 %v4178_v10 }
 0x199   :  { %2369 = vmatpush3.msra.mxu1 %v3252_v37 }
 0x19a   :  { %2370 = vmatprep.subr.mxu1 %v4178_v10 }
 0x19b   :  { %2371 = vmatpush3.msra.mxu1 %v3259_v38 }
 0x19c   :  { %2372 = vmatprep.subr.mxu1 %v4178_v10 }
 0x19d   :  { %2373 = vmatpush3.msra.mxu1 %v3266_v43 }
 0x19e   :  { %2374 = vmatprep.subr.mxu1 %v4178_v10 }
 0x19f   :  { %2375 = vmatpush3.msra.mxu1 %v3273_v44 }
 0x1a0   :  { %2376 = vmatprep.subr.mxu1 %v4178_v10 }
 0x1a1   :  { %2377 = vmatpush3.msra.mxu1 %v3280_v49 }
 0x1a2   :  { %2378 = vmatprep.subr.mxu1 %v4178_v10 }
 0x1a3   :  { %2379 = vmatpush3.msra.mxu1 %v3287_v52 }
 0x1a4   :  { %2380 = vmatprep.subr.mxu1 %v4178_v10 }
 0x1a5   :  { %2381 = vmatpush3.msra.mxu1 %v3294_v6 }
 0x1a6   :  { %2385 = vmatprep.subr.mxu1 %v4178_v10 }
 0x206   :  { %v331_v16 = vpop.f32.mrf.mxu1 }
 0x208   :  { %v333_v18 = vpop.f32.mrf.mxu1 }
 0x20a   :  { %v337_v20 = vpop.f32.mrf.mxu1 }
 0x20b   :  { %v3339_v22 = vadd.f32 %v337_v20, %v228_v19 }
 0x20c   :  { %v339_v23 = vpop.f32.mrf.mxu1 }
 0x20d   :  { %4208 = vst [vmem:[#allocation10_spill] sm:$0xff] %v3339_v22  ;;  %v3341_v24 = vadd.f32 %v339_v23, %v232_v21 }
 0x20e   :  { %v343_v25 = vpop.f32.mrf.mxu1 }
 0x20f   :  { %4209 = vst [vmem:[#allocation11_spill] sm:$0xff] %v3341_v24  ;;  %v3343_v10 = vadd.f32 %v343_v25, %v228_v19  ;;  %v332_v24 = vadd.f32 %v331_v16, %v228_v19  ;;  %v629_v25 = vpop.f32.mrf.mxu0 }
 0x210   :  { %v345_v32 = vpop.f32.mrf.mxu1 }
 0x211   :  { %4210 = vst [vmem:[#allocation12_spill] sm:$0xff] %v3343_v10  ;;  %v3345_v31 = vadd.f32 %v345_v32, %v232_v21 }
 0x212   :  { %v349_v6 = vpop.f32.mrf.mxu1 }
 0x213   :  { %4211 = vst [vmem:[#allocation13_spill] sm:$0xff] %v3345_v31  ;;  %v3347_v13 = vadd.f32 %v349_v6, %v228_v19  ;;  %v704_v6 = vadd.f32 %v629_v25, %v332_v24 }
 0x214   :  { %v351_v12 = vpop.f32.mrf.mxu1 }
 0x215   :  { %4212 = vst [vmem:[#allocation14_spill] sm:$0xff] %v3347_v13  ;;  %v3349_v52 = vadd.f32 %v351_v12, %v232_v21  ;;  %v235_v12 = vsub.s32 2, %v226_v7 }
 0x216   :  { %v355_v11 = vpop.f32.mrf.mxu1 }
 0x217   :  { %4213 = vst [vmem:[#allocation15_spill] sm:$0xff] %v3349_v52  ;;  %v3351_v9 = vadd.f32 %v355_v11, %v228_v19 }
 0x218   :  { %v357_v17 = vpop.f32.mrf.mxu1 }
 0x219   :  { %4214 = vst [vmem:[#allocation16_spill] sm:$0xff] %v3351_v9  ;;  %v3353_v20 = vadd.f32 %v357_v17, %v232_v21  ;;  %v2044_v9 = vmul.f32 -1.442695, %v704_v6  ;;  %v631_v6 = vpop.f32.mrf.mxu0 }
 0x21a   :  { %v361_v23 = vpop.f32.mrf.mxu1 }
 0x21b   :  { %4215 = vst [vmem:[#allocation17_spill] sm:$0xff] %v3353_v20  ;;  %v3355_v22 = vadd.f32 %v361_v23, %v228_v19  ;;  %v236_v20 = vrot.slane %v223_v15, %v235_v12  ;;  %2636 = vpow2.f32 %v2044_v9 }
 0x21c   :  { %v363_v10 = vpop.f32.mrf.mxu1 }
 0x21d   :  { %4216 = vst [vmem:[#allocation18_spill] sm:$0xff] %v3355_v22  ;;  %v3357_v32 = vadd.f32 %v363_v10, %v232_v21 }
 0x21e   :  { %v367_v31 = vpop.f32.mrf.mxu1 }
 0x21f   :  { %4217 = vst [vmem:[#allocation19_spill] sm:$0xff] %v3357_v32  ;;  %v3359_v13 = vadd.f32 %v367_v31, %v228_v19 }
 0x220   :  { %v369_v52 = vpop.f32.mrf.mxu1 }
 0x221   :  { %4218 = vst [vmem:[#allocation20_spill] sm:$0xff] %v3359_v13  ;;  %v3361_v8 = vadd.f32 %v369_v52, %v232_v21  ;;  %v334_v52 = vadd.f32 %v333_v18, %v232_v21 }
 0x222   :  { %v373_v11 = vpop.f32.mrf.mxu1 }
 0x223   :  { %4219 = vst [vmem:[#allocation21_spill] sm:$0xff] %v3361_v8  ;;  %v3363_v17 = vadd.f32 %v373_v11, %v228_v19  ;;  %v705_v11 = vadd.f32 %v631_v6, %v334_v52 }
 0x224   :  { %v375_v16 = vpop.f32.mrf.mxu1 }
 0x225   :  { %4220 = vst [vmem:[#allocation22_spill] sm:$0xff] %v3363_v17  ;;  %v3365_v23 = vadd.f32 %v375_v16, %v232_v21 }
 0x226   :  { %v2305_v22 = vpop.f32.mrf.mxu1 }
 0x227   :  { %4221 = vst [vmem:[#allocation23_spill] sm:$0xff] %v3365_v23  ;;  %v3367_v10 = vadd.f32 %v2305_v22, %v236_v20 }
 0x228   :  { %v444_v32 = vpop.f32.mrf.mxu1  ;;  %v2637_v22 = vpop.eup %2636 }
 0x229   :  { %v712_v13 = vadd.f32 1.0, %v2637_v22 }
 0x22a   :  { %v2308_v24 = vpop.f32.mrf.mxu1 }
 0x22b   :  { %v3369_v31 = vadd.f32 %v2308_v24, %v236_v20  ;;  %v2045_v24 = vmul.f32 -1.442695, %v705_v11 }
 0x22c   :  { %v454_v7 = vpop.f32.mrf.mxu1 }
 0x22d   :  { %4222 = vst [vmem:[#allocation24_spill] sm:$0xff] %v3369_v31  ;;  %v3371_v25 = vadd.f32 %v454_v7, %v236_v20  ;;  %2638 = vpow2.f32 %v2045_v24 }
 0x22e   :  { %v2311_v8 = vpop.f32.mrf.mxu1  ;;  %2640 = vrcp.f32 %v712_v13 }
 0x22f   :  { %4223 = vst [vmem:[#allocation25_spill] sm:$0xff] %v3371_v25  ;;  %v3373_v19 = vadd.f32 %v2311_v8, %v236_v20  ;;  %v3384_v8 = vld [vmem:[%s4174_s6] ss:$0 sm:$0xff] }
 0x230   :  { %v464_v15 = vpop.f32.mrf.mxu1 }
 0x231   :  { %4224 = vst [vmem:[#allocation26_spill] sm:$0xff] %v3373_v19  ;;  %v3375_v12 = vadd.f32 %v464_v15, %v236_v20  ;;  %v445_v15 = vadd.f32 %v444_v32, %v236_v20  ;;  %v4230_v32 = vld [vmem:[#allocation5_spill] sm:$0xff] }
 0x232   :  { %v2314_v16 = vpop.f32.mrf.mxu1 }
 0x233   :  { %4225 = vst [vmem:[#allocation27_spill] sm:$0xff] %v3375_v12  ;;  %v3377_v9 = vadd.f32 %v2314_v16, %v236_v20 }
 0x234   :  { %v474_v23 = vpop.f32.mrf.mxu1 }
 0x235   :  { %4226 = vst [vmem:[#allocation28_spill] sm:$0xff] %v3377_v9  ;;  %v3379_v17 = vadd.f32 %v474_v23, %v236_v20  ;;  %v4228_v20 = vmov 0.0  }
 0x237   :  { %4227 = vst [vmem:[#allocation29_spill] sm:$0xff] %v3379_v17 }
 0x23a   :  { %v2639_v21 = vpop.eup %2638 }
 0x23b   :  { %v2641_v52 = vpop.eup %2640  ;;  %v713_v9 = vadd.f32 1.0, %v2639_v21  ;;  %v4233_v21 = vld [vmem:[#allocation7_spill] sm:$0xff] }
 0x246   :  { %v700_v18 = vpop.f32.mrf.mxu1 }
 0x247   :  { %v724_v7 = vadd.f32 %v3384_v8, %v700_v18  ;;  %v4232_v18 = vld [vmem:[#allocation6_spill] sm:$0xff] }
 0x248   :  { %v2349_v6 = vpop.f32.mrf.mxu1 }
 0x249   :  { %v725_v16 = vmul.f32 %v2641_v52, %v724_v7  ;;  %v4234_v7 = vld [vmem:[#allocation9_spill] sm:$0xff]  ;;  %v4235_v52 = vld [vmem:[#allocation3_spill] sm:$0xff] }
 0x24b   :  { %v726_v23 = vadd.f32 %v725_v16, %v445_v15  ;;  %v4236_v16 = vld [vmem:[#allocation10_spill] sm:$0xff] }
 0x24d   :  { %2642 = vtanh.f32 %v726_v23 }
 0x24e   :  { %2644 = vrcp.f32 %v713_v9  ;;  %v4231_v9 = vld [vmem:[#allocation8_spill] sm:$0xff] }
 0x25a   :  { %v2643_v11 = vpop.eup %2642 }
 0x25b   :  { %v728_v13 = vsub.f32 %v3115_v14, %v2643_v11  ;;  %v2645_v22 = vpop.eup %2644  ;;  %v4229_v14 = vld [vmem:[#allocation4_spill] sm:$0xff] }
 0x25d   :  { %v729_v24 = vmul.f32 %v2645_v22, %v728_v13 }
 0x25f   :  { %v3388_v17 = vadd.f32 %v2643_v11, %v729_v24  ;;  %v4237_v24 = vld [vmem:[#allocation11_spill] sm:$0xff] }
 0x261   :  { %802 = vmatmul.mubr.f32.vlgmr.msra.gmra.mxu0 %v3388_v17  ;;  %2383 = vmatmul.mubr.f32.vlgmr.msra.gmra.mxu1 %v3388_v17 }
 0x262   :  { %906 = vmatpush1.msra.mxu0 %v2919_v39  ;;  %2386 = vmatpush3.msra.mxu1 %v3182_v26 }
 0x263   :  { %907 = vmatprep.subr.mxu0 %v2924_v40  ;;  %2387 = vmatprep.subr.mxu1 %v4228_v20 }
 0x264   :  { %908 = vmatpush1.msra.mxu0 %v2929_v41  ;;  %2388 = vmatpush3.msra.mxu1 %v3188_v27 }
 0x265   :  { %909 = vmatprep.subr.mxu0 %v2935_v42  ;;  %2389 = vmatprep.subr.mxu1 %v4228_v20 }
 0x266   :  { %910 = vmatpush1.msra.mxu0 %v2941_v45  ;;  %2390 = vmatpush3.msra.mxu1 %v3196_v28 }
 0x267   :  { %911 = vmatprep.subr.mxu0 %v2947_v46  ;;  %2391 = vmatprep.subr.mxu1 %v4228_v20 }
 0x268   :  { %912 = vmatpush1.msra.mxu0 %v2953_v47  ;;  %2392 = vmatpush3.msra.mxu1 %v3204_v29 }
 0x269   :  { %913 = vmatprep.subr.mxu0 %v2959_v48  ;;  %2393 = vmatprep.subr.mxu1 %v4228_v20 }
 0x26a   :  { %914 = vmatpush1.msra.mxu0 %v2965_v50  ;;  %2394 = vmatpush3.msra.mxu1 %v3212_v30 }
 0x26b   :  { %915 = vmatprep.subr.mxu0 %v2971_v51  ;;  %2395 = vmatprep.subr.mxu1 %v4228_v20 }
 0x26c   :  { %916 = vmatpush1.msra.mxu0 %v2977_v53  ;;  %2396 = vmatpush3.msra.mxu1 %v3220_v33 }
 0x26d   :  { %917 = vmatprep.subr.mxu0 %v2983_v54  ;;  %2397 = vmatprep.subr.mxu1 %v4228_v20 }
 0x26e   :  { %918 = vmatpush1.msra.mxu0 %v2989_v55  ;;  %2398 = vmatpush3.msra.mxu1 %v3228_v34 }
 0x26f   :  { %919 = vmatprep.subr.mxu0 %v2995_v56  ;;  %2399 = vmatprep.subr.mxu1 %v4228_v20 }
 0x270   :  { %920 = vmatpush1.msra.mxu0 %v3001_v57  ;;  %2400 = vmatpush3.msra.mxu1 %v3236_v35 }
 0x271   :  { %921 = vmatprep.subr.mxu0 %v3007_v58  ;;  %2401 = vmatprep.subr.mxu1 %v4228_v20 }
 0x272   :  { %922 = vmatpush1.msra.mxu0 %v3013_v59  ;;  %2402 = vmatpush3.msra.mxu1 %v3245_v36 }
 0x273   :  { %923 = vmatprep.subr.mxu0 %v3019_v60  ;;  %2403 = vmatprep.subr.mxu1 %v4228_v20 }
 0x274   :  { %924 = vmatpush1.msra.mxu0 %v3025_v61  ;;  %2404 = vmatpush3.msra.mxu1 %v3252_v37 }
 0x275   :  { %925 = vmatprep.subr.mxu0 %v3031_v62  ;;  %2405 = vmatprep.subr.mxu1 %v4228_v20 }
 0x276   :  { %926 = vmatpush1.msra.mxu0 %v3037_v63  ;;  %2406 = vmatpush3.msra.mxu1 %v3259_v38 }
 0x277   :  { %927 = vmatprep.subr.mxu0 %v3043_v0  ;;  %2407 = vmatprep.subr.mxu1 %v4228_v20 }
 0x278   :  { %928 = vmatpush1.msra.mxu0 %v3049_v1  ;;  %2408 = vmatpush3.msra.mxu1 %v3266_v43 }
 0x279   :  { %929 = vmatprep.subr.mxu0 %v3055_v2  ;;  %2409 = vmatprep.subr.mxu1 %v4228_v20 }
 0x27a   :  { %930 = vmatpush1.msra.mxu0 %v3061_v3  ;;  %2410 = vmatpush3.msra.mxu1 %v3273_v44 }
 0x27b   :  { %931 = vmatprep.subr.mxu0 %v3067_v4  ;;  %2411 = vmatprep.subr.mxu1 %v4228_v20 }
 0x27c   :  { %932 = vmatpush1.msra.mxu0 %v3075_v5  ;;  %2412 = vmatpush3.msra.mxu1 %v3280_v49 }
 0x27d   :  { %933 = vmatprep.subr.mxu0 %v4229_v14  ;;  %2413 = vmatprep.subr.mxu1 %v4228_v20 }
 0x27e   :  { %934 = vmatpush1.msra.mxu0 %v4230_v32  ;;  %2414 = vmatpush3.msra.mxu1 %v4231_v9 }
 0x27f   :  { %935 = vmatprep.subr.mxu0 %v4232_v18  ;;  %2415 = vmatprep.subr.mxu1 %v4228_v20 }
 0x280   :  { %936 = vmatpush1.msra.mxu0 %v4233_v21  ;;  %969 = vmatprep.mubr.f32.mxu0 %v4228_v20 }
 0x281   :  { %2416 = vmatpush3.msra.mxu1 %v4234_v7  ;;  %2417 = vmatprep.mubr.msk.f32.mxu1 %vm2768_vm9, %v4228_v20 }
 0x282   :  { %1073 = vmatprep.subr.mxu0 %v4235_v52  ;;  %2420 = vmatprep.subr.mxu1 %v4228_v20 }
 0x321   :  { %v803_v6 = vpop.f32.mrf.mxu0  ;;  %v874_v15 = vpop.f32.mrf.mxu1 }
 0x322   :  { %v878_v23 = vadd.f32 %v803_v6, %v4236_v16  ;;  %v892_v52 = vadd.f32 %v3384_v8, %v874_v15  ;;  %v3596_v15 = vld [vmem:[%s4171_s4 + $0x110] sm:$0xff] }
 0x323   :  { %v2384_v11 = vpop.f32.mrf.mxu1  ;;  %v805_v22 = vpop.f32.mrf.mxu0 }
 0x324   :  { %v2047_v13 = vmul.f32 -1.442695, %v878_v23  ;;  %v879_v19 = vadd.f32 %v805_v22, %v4237_v24  ;;  %v3610_v22 = vld [vmem:[%s4171_s4 + $0xf8] sm:$0xff]  ;;  %v3617_v24 = vld [vmem:[%s4171_s4 + $0xf0] sm:$0xff] }
 0x326   :  { %2646 = vpow2.f32 %v2047_v13  ;;  %v2048_v12 = vmul.f32 -1.442695, %v879_v19  ;;  %v3603_v13 = vld [vmem:[%s4171_s4 + $0x108] sm:$0xff] }
 0x328   :  { %2648 = vpow2.f32 %v2048_v12  ;;  %v3547_v12 = vld [vmem:[%s4171_s4 + $0x168] sm:$0xff] }
 0x333   :  { %v2647_v31 = vpop.eup %2646 }
 0x334   :  { %v886_v25 = vadd.f32 1.0, %v2647_v31 }
 0x335   :  { %v2649_v7 = vpop.eup %2648 }
 0x336   :  { %2650 = vrcp.f32 %v886_v25  ;;  %v887_v32 = vadd.f32 1.0, %v2649_v7  ;;  %v3582_v7 = vld [vmem:[%s4171_s4 + $0x128] sm:$0xff] }
 0x343   :  { %v2651_v21 = vpop.eup %2650 }
 0x344   :  { %v893_v18 = vmul.f32 %v2651_v21, %v892_v52  ;;  %v3575_v21 = vld [vmem:[%s4171_s4 + $0x138] sm:$0xff]  ;;  %v3589_v52 = vld [vmem:[%s4171_s4 + $0x120] sm:$0xff] }
 0x346   :  { %v894_v9 = vadd.f32 %v893_v18, %v3367_v10  ;;  %v3568_v18 = vld [vmem:[%s4171_s4 + $0x140] sm:$0xff] }
 0x348   :  { %2652 = vtanh.f32 %v894_v9  ;;  %v3561_v9 = vld [vmem:[%s4171_s4 + $0x150] sm:$0xff] }
 0x349   :  { %2654 = vrcp.f32 %v887_v32  ;;  %v3554_v32 = vld [vmem:[%s4171_s4 + $0x158] sm:$0xff] }
 0x355   :  { %v2653_v6 = vpop.eup %2652 }
 0x356   :  { %v896_v16 = vsub.f32 %v3388_v17, %v2653_v6  ;;  %v2655_v23 = vpop.eup %2654 }
 0x358   :  { %v897_v11 = vmul.f32 %v2655_v23, %v896_v16  ;;  %v3631_v16 = vld [vmem:[%s4171_s4 + $0xd8] sm:$0xff]  ;;  %v3638_v23 = vld [vmem:[%s4171_s4 + $0xc8] sm:$0xff] }
 0x35a   :  { %v3464_v19 = vadd.f32 %v2653_v6, %v897_v11  ;;  %v3624_v6 = vld [vmem:[%s4171_s4 + $0xe0] sm:$0xff] }
 0x35b   :  { %v3645_v11 = vld [vmem:[%s4171_s4 + $0xc0] sm:$0xff] }
 0x35c   :  { %970 = vmatmul.mubr.f32.vlgmr.msra.gmra.mxu0 %v3464_v19  ;;  %2418 = vmatmul.mubr.f32.vlgmr.msra.gmra.mxu1 %v3464_v19 }
 0x35d   :  { %1074 = vmatpush1.msra.mxu0 %v2919_v39  ;;  %2421 = vmatpush3.msra.mxu1 %v3182_v26  ;;  %v4238_v39 = vld [vmem:[#allocation5_spill] sm:$0xff] }
 0x35e   :  { %1075 = vmatprep.subr.mxu0 %v2924_v40  ;;  %2422 = vmatprep.subr.mxu1 %v4228_v20  ;;  %v4239_v40 = vld [vmem:[#allocation8_spill] sm:$0xff] }
 0x35f   :  { %1076 = vmatpush1.msra.mxu0 %v2929_v41  ;;  %2423 = vmatpush3.msra.mxu1 %v3188_v27  ;;  %v4240_v41 = vld [vmem:[#allocation6_spill] sm:$0xff] }
 0x360   :  { %1077 = vmatprep.subr.mxu0 %v2935_v42  ;;  %2424 = vmatprep.subr.mxu1 %v4228_v20  ;;  %v4241_v42 = vld [vmem:[#allocation7_spill] sm:$0xff] }
 0x361   :  { %1078 = vmatpush1.msra.mxu0 %v2941_v45  ;;  %2425 = vmatpush3.msra.mxu1 %v3196_v28  ;;  %v4242_v45 = vld [vmem:[#allocation9_spill] sm:$0xff] }
 0x362   :  { %1079 = vmatprep.subr.mxu0 %v2947_v46  ;;  %2426 = vmatprep.subr.mxu1 %v4228_v20  ;;  %v4243_v46 = vld [vmem:[#allocation3_spill] sm:$0xff] }
 0x363   :  { %1080 = vmatpush1.msra.mxu0 %v2953_v47  ;;  %2427 = vmatpush3.msra.mxu1 %v3204_v29 }
 0x364   :  { %1081 = vmatprep.subr.mxu0 %v2959_v48  ;;  %2428 = vmatprep.subr.mxu1 %v4228_v20 }
 0x365   :  { %1082 = vmatpush1.msra.mxu0 %v2965_v50  ;;  %2429 = vmatpush3.msra.mxu1 %v3212_v30  ;;  %v4244_v50 = vld [vmem:[#allocation12_spill] sm:$0xff] }
 0x366   :  { %1083 = vmatprep.subr.mxu0 %v2971_v51  ;;  %2430 = vmatprep.subr.mxu1 %v4228_v20 }
 0x367   :  { %1084 = vmatpush1.msra.mxu0 %v2977_v53  ;;  %2431 = vmatpush3.msra.mxu1 %v3220_v33 }
 0x368   :  { %1085 = vmatprep.subr.mxu0 %v2983_v54  ;;  %2432 = vmatprep.subr.mxu1 %v4228_v20 }
 0x369   :  { %1086 = vmatpush1.msra.mxu0 %v2989_v55  ;;  %2433 = vmatpush3.msra.mxu1 %v3228_v34 }
 0x36a   :  { %1087 = vmatprep.subr.mxu0 %v2995_v56  ;;  %2434 = vmatprep.subr.mxu1 %v4228_v20  ;;  %v4245_v56 = vld [vmem:[#allocation13_spill] sm:$0xff] }
 0x36b   :  { %1088 = vmatpush1.msra.mxu0 %v3001_v57  ;;  %2435 = vmatpush3.msra.mxu1 %v3236_v35 }
 0x36c   :  { %1089 = vmatprep.subr.mxu0 %v3007_v58  ;;  %2436 = vmatprep.subr.mxu1 %v4228_v20 }
 0x36d   :  { %1090 = vmatpush1.msra.mxu0 %v3013_v59  ;;  %2437 = vmatpush3.msra.mxu1 %v3245_v36 }
 0x36e   :  { %1091 = vmatprep.subr.mxu0 %v3019_v60  ;;  %2438 = vmatprep.subr.mxu1 %v4228_v20 }
 0x36f   :  { %1092 = vmatpush1.msra.mxu0 %v3025_v61  ;;  %2439 = vmatpush3.msra.mxu1 %v3252_v37 }
 0x370   :  { %1093 = vmatprep.subr.mxu0 %v3031_v62  ;;  %2440 = vmatprep.subr.mxu1 %v4228_v20 }
 0x371   :  { %1094 = vmatpush1.msra.mxu0 %v3037_v63  ;;  %2441 = vmatpush3.msra.mxu1 %v3259_v38 }
 0x372   :  { %1095 = vmatprep.subr.mxu0 %v3043_v0  ;;  %2442 = vmatprep.subr.mxu1 %v4228_v20 }
 0x373   :  { %1096 = vmatpush1.msra.mxu0 %v3049_v1  ;;  %2443 = vmatpush3.msra.mxu1 %v3266_v43  ;;  %v4246_v1 = vld [vmem:[#allocation25_spill] sm:$0xff] }
 0x374   :  { %1097 = vmatprep.subr.mxu0 %v3055_v2  ;;  %2444 = vmatprep.subr.mxu1 %v4228_v20 }
 0x375   :  { %1098 = vmatpush1.msra.mxu0 %v3061_v3  ;;  %2445 = vmatpush3.msra.mxu1 %v3273_v44 }
 0x376   :  { %1099 = vmatprep.subr.mxu0 %v3067_v4  ;;  %2446 = vmatprep.subr.mxu1 %v4228_v20 }
 0x377   :  { %1100 = vmatpush1.msra.mxu0 %v3075_v5  ;;  %2447 = vmatpush3.msra.mxu1 %v3280_v49 }
 0x378   :  { %1101 = vmatprep.subr.mxu0 %v4229_v14  ;;  %2448 = vmatprep.subr.mxu1 %v4228_v20 }
 0x379   :  { %1102 = vmatpush1.msra.mxu0 %v4238_v39  ;;  %2449 = vmatpush3.msra.mxu1 %v4239_v40 }
 0x37a   :  { %1103 = vmatprep.subr.mxu0 %v4240_v41  ;;  %2450 = vmatprep.subr.mxu1 %v4228_v20 }
 0x37b   :  { %1104 = vmatpush1.msra.mxu0 %v4241_v42  ;;  %1137 = vmatprep.mubr.f32.mxu0 %v4228_v20 }
 0x37c   :  { %2451 = vmatpush3.msra.mxu1 %v4242_v45  ;;  %2452 = vmatprep.mubr.msk.f32.mxu1 %vm2768_vm9, %v4228_v20 }
 0x37d   :  { %1241 = vmatprep.subr.mxu0 %v4243_v46  ;;  %2455 = vmatprep.subr.mxu1 %v4228_v20  ;;  %v3659_v46 = vld [vmem:[%s4171_s4 + $0xa8] sm:$0xff] }
 0x41c   :  { %v971_v47 = vpop.f32.mrf.mxu0  ;;  %v1042_v48 = vpop.f32.mrf.mxu1 }
 0x41d   :  { %v1046_v51 = vadd.f32 %v971_v47, %v4244_v50  ;;  %v1060_v62 = vadd.f32 %v3384_v8, %v1042_v48  ;;  %v3666_v47 = vld [vmem:[%s4171_s4 + $0x98] sm:$0xff]  ;;  %v3673_v48 = vld [vmem:[%s4171_s4 + $0x90] sm:$0xff]  ;;  %v3680_v50 = vld [vmem:[%s4171_s4 + $0x80] sm:$0xff] }
 0x41e   :  { %v2419_v53 = vpop.f32.mrf.mxu1  ;;  %v973_v55 = vpop.f32.mrf.mxu0 }
 0x41f   :  { %v2049_v54 = vmul.f32 -1.442695, %v1046_v51  ;;  %v1047_v57 = vadd.f32 %v973_v55, %v4245_v56  ;;  %v3687_v51 = vld [vmem:[%s4171_s4 + $0x78] sm:$0xff]  ;;  %v3694_v53 = vld [vmem:[%s4171_s4 + $0x68] sm:$0xff]  ;;  %v3708_v55 = vld [vmem:[%s4171_s4 + $0x50] sm:$0xff] }
 0x420   :  { %v3715_v56 = vld [vmem:[%s4171_s4 + $0x48] sm:$0xff] }
 0x421   :  { %2656 = vpow2.f32 %v2049_v54  ;;  %v2050_v58 = vmul.f32 -1.442695, %v1047_v57  ;;  %v3701_v54 = vld [vmem:[%s4171_s4 + $0x60] sm:$0xff]  ;;  %v3722_v57 = vld [vmem:[%s4171_s4 + $0x38] sm:$0xff] }
 0x423   :  { %2658 = vpow2.f32 %v2050_v58 }
 0x42e   :  { %v2657_v59 = vpop.eup %2656 }
 0x42f   :  { %v1054_v60 = vadd.f32 1.0, %v2657_v59 }
 0x430   :  { %v2659_v61 = vpop.eup %2658 }
 0x431   :  { %2660 = vrcp.f32 %v1054_v60  ;;  %v1055_v3 = vadd.f32 1.0, %v2659_v61  ;;  %v4249_v61 = vld [vmem:[#allocation15_spill] sm:$0xff] }
 0x43e   :  { %v2661_v63 = vpop.eup %2660 }
 0x43f   :  { %v1061_v0 = vmul.f32 %v2661_v63, %v1060_v62 }
 0x441   :  { %v1062_v2 = vadd.f32 %v1061_v0, %v4246_v1 }
 0x443   :  { %2662 = vtanh.f32 %v1062_v2 }
 0x444   :  { %2664 = vrcp.f32 %v1055_v3 }
 0x450   :  { %v2663_v4 = vpop.eup %2662 }
 0x451   :  { %v1064_v17 = vsub.f32 %v3464_v19, %v2663_v4  ;;  %v2665_v10 = vpop.eup %2664  ;;  %v3652_v19 = vld [vmem:[%s4171_s4 + $0xb0] sm:$0xff] }
 0x453   :  { %v1065_v31 = vmul.f32 %v2665_v10, %v1064_v17  ;;  %v4250_v10 = vld [vmem:[#allocation24_spill] sm:$0xff] }
 0x455   :  { %v3540_v25 = vadd.f32 %v2663_v4, %v1065_v31 }
 0x457   :  { %1138 = vmatmul.mubr.f32.vlgmr.msra.gmra.mxu0 %v3540_v25  ;;  %2453 = vmatmul.mubr.f32.vlgmr.msra.gmra.mxu1 %v3540_v25 }
 0x458   :  { %1242 = vmatpush1.msra.mxu0 %v3547_v12  ;;  %2456 = vmatpush3.msra.mxu1 %v3182_v26 }
 0x459   :  { %1243 = vmatprep.subr.mxu0 %v3554_v32  ;;  %2457 = vmatprep.subr.mxu1 %v4228_v20 }
 0x45a   :  { %1244 = vmatpush1.msra.mxu0 %v3561_v9  ;;  %2458 = vmatpush3.msra.mxu1 %v3188_v27 }
 0x45b   :  { %1245 = vmatprep.subr.mxu0 %v3568_v18  ;;  %2459 = vmatprep.subr.mxu1 %v4228_v20 }
 0x45c   :  { %1246 = vmatpush1.msra.mxu0 %v3575_v21  ;;  %2460 = vmatpush3.msra.mxu1 %v3196_v28 }
 0x45d   :  { %1247 = vmatprep.subr.mxu0 %v3582_v7  ;;  %2461 = vmatprep.subr.mxu1 %v4228_v20 }
 0x45e   :  { %1248 = vmatpush1.msra.mxu0 %v3589_v52  ;;  %2462 = vmatpush3.msra.mxu1 %v3204_v29 }
 0x45f   :  { %1249 = vmatprep.subr.mxu0 %v3596_v15  ;;  %2463 = vmatprep.subr.mxu1 %v4228_v20 }
 0x460   :  { %1250 = vmatpush1.msra.mxu0 %v3603_v13  ;;  %2464 = vmatpush3.msra.mxu1 %v3212_v30 }
 0x461   :  { %1251 = vmatprep.subr.mxu0 %v3610_v22  ;;  %2465 = vmatprep.subr.mxu1 %v4228_v20 }
 0x462   :  { %1252 = vmatpush1.msra.mxu0 %v3617_v24  ;;  %2466 = vmatpush3.msra.mxu1 %v3220_v33 }
 0x463   :  { %1253 = vmatprep.subr.mxu0 %v3624_v6  ;;  %2467 = vmatprep.subr.mxu1 %v4228_v20 }
 0x464   :  { %1254 = vmatpush1.msra.mxu0 %v3631_v16  ;;  %2468 = vmatpush3.msra.mxu1 %v3228_v34 }
 0x465   :  { %1255 = vmatprep.subr.mxu0 %v3638_v23  ;;  %2469 = vmatprep.subr.mxu1 %v4228_v20 }
 0x466   :  { %1256 = vmatpush1.msra.mxu0 %v3645_v11  ;;  %2470 = vmatpush3.msra.mxu1 %v3236_v35 }
 0x467   :  { %1257 = vmatprep.subr.mxu0 %v3652_v19  ;;  %2471 = vmatprep.subr.mxu1 %v4228_v20 }
 0x468   :  { %1258 = vmatpush1.msra.mxu0 %v3659_v46  ;;  %2472 = vmatpush3.msra.mxu1 %v3245_v36 }
 0x469   :  { %1259 = vmatprep.subr.mxu0 %v3666_v47  ;;  %2473 = vmatprep.subr.mxu1 %v4228_v20 }
 0x46a   :  { %1260 = vmatpush1.msra.mxu0 %v3673_v48  ;;  %2474 = vmatpush3.msra.mxu1 %v3252_v37 }
 0x46b   :  { %1261 = vmatprep.subr.mxu0 %v3680_v50  ;;  %2475 = vmatprep.subr.mxu1 %v4228_v20 }
 0x46c   :  { %1262 = vmatpush1.msra.mxu0 %v3687_v51  ;;  %2476 = vmatpush3.msra.mxu1 %v3259_v38 }
 0x46d   :  { %1263 = vmatprep.subr.mxu0 %v3694_v53  ;;  %2477 = vmatprep.subr.mxu1 %v4228_v20 }
 0x46e   :  { %1264 = vmatpush1.msra.mxu0 %v3701_v54  ;;  %2478 = vmatpush3.msra.mxu1 %v3266_v43 }
 0x46f   :  { %1265 = vmatprep.subr.mxu0 %v3708_v55  ;;  %2479 = vmatprep.subr.mxu1 %v4228_v20 }
 0x470   :  { %1266 = vmatpush1.msra.mxu0 %v3715_v56  ;;  %2480 = vmatpush3.msra.mxu1 %v3273_v44 }
 0x471   :  { %1267 = vmatprep.subr.mxu0 %v3722_v57  ;;  %2481 = vmatprep.subr.mxu1 %v4228_v20 }
 0x472   :  { %1268 = vmatpush1.msra.mxu0 %v3075_v5  ;;  %2482 = vmatpush3.msra.mxu1 %v3280_v49  ;;  %v3742_v5 = vld [vmem:[%s4171_s4 + $0x170] sm:$0xff] }
 0x473   :  { %1269 = vmatprep.subr.mxu0 %v4229_v14  ;;  %2483 = vmatprep.subr.mxu1 %v4228_v20  ;;  %4247 = vst [vmem:[#allocation4_spill] sm:$0xff] %v3742_v5 }
 0x474   :  { %1270 = vmatpush1.msra.mxu0 %v4238_v39  ;;  %2484 = vmatpush3.msra.mxu1 %v4239_v40 }
 0x475   :  { %1271 = vmatprep.subr.mxu0 %v4240_v41  ;;  %2485 = vmatprep.subr.mxu1 %v4228_v20  ;;  %v4248_v41 = vld [vmem:[#allocation14_spill] sm:$0xff] }
 0x476   :  { %1272 = vmatpush1.msra.mxu0 %v4241_v42  ;;  %1305 = vmatprep.mubr.f32.mxu0 %v4228_v20 }
 0x477   :  { %2486 = vmatpush3.msra.mxu1 %v4242_v45  ;;  %2487 = vmatprep.mubr.msk.f32.mxu1 %vm2768_vm9, %v4228_v20 }
 0x478   :  { %1409 = vmatprep.subr.mxu0 %v3742_v5  ;;  %2490 = vmatprep.subr.mxu1 %v4228_v20 }
 0x517   :  { %v1139_v14 = vpop.f32.mrf.mxu0  ;;  %v1210_v39 = vpop.f32.mrf.mxu1 }
 0x518   :  { %v1214_v42 = vadd.f32 %v1139_v14, %v4248_v41  ;;  %v1228_v3 = vadd.f32 %v3384_v8, %v1210_v39 }
 0x519   :  { %v2454_v58 = vpop.f32.mrf.mxu1  ;;  %v1141_v60 = vpop.f32.mrf.mxu0 }
 0x51a   :  { %v2051_v59 = vmul.f32 -1.442695, %v1214_v42  ;;  %v1215_v62 = vadd.f32 %v1141_v60, %v4249_v61 }
 0x51c   :  { %2666 = vpow2.f32 %v2051_v59  ;;  %v2052_v63 = vmul.f32 -1.442695, %v1215_v62 }
 0x51e   :  { %2668 = vpow2.f32 %v2052_v63  ;;  %v4257_v63 = vld [vmem:[#allocation27_spill] sm:$0xff] }
 0x529   :  { %v2667_v0 = vpop.eup %2666 }
 0x52a   :  { %v1222_v1 = vadd.f32 1.0, %v2667_v0 }
 0x52b   :  { %v2669_v2 = vpop.eup %2668 }
 0x52c   :  { %2670 = vrcp.f32 %v1222_v1  ;;  %v1223_v5 = vadd.f32 1.0, %v2669_v2 }
 0x539   :  { %v2671_v4 = vpop.eup %2670 }
 0x53a   :  { %v1229_v17 = vmul.f32 %v2671_v4, %v1228_v3 }
 0x53c   :  { %v1230_v31 = vadd.f32 %v1229_v17, %v4250_v10 }
 0x53e   :  { %2672 = vtanh.f32 %v1230_v31  ;;  %v3860_v31 = vld [vmem:[%s4171_s4 + $0x178] sm:$0xff] }
 0x53f   :  { %2674 = vrcp.f32 %v1223_v5 }
 0x54b   :  { %v2673_v14 = vpop.eup %2672 }
 0x54c   :  { %v1232_v41 = vsub.f32 %v3540_v25, %v2673_v14  ;;  %v2675_v42 = vpop.eup %2674 }
 0x54e   :  { %v1233_v58 = vmul.f32 %v2675_v42, %v1232_v41  ;;  %v3878_v41 = vld [vmem:[%s4171_s4 + $0x148] sm:$0xff]  ;;  %v3887_v42 = vld [vmem:[%s4171_s4 + $0x130] sm:$0xff] }
 0x550   :  { %v3751_v59 = vadd.f32 %v2673_v14, %v1233_v58  ;;  %v3869_v14 = vld [vmem:[%s4171_s4 + $0x160] sm:$0xff]  ;;  %v3896_v58 = vld [vmem:[%s4171_s4 + $0x118] sm:$0xff] }
 0x552   :  { %1306 = vmatmul.mubr.f32.vlgmr.msra.gmra.mxu0 %v3751_v59  ;;  %2488 = vmatmul.mubr.f32.vlgmr.msra.gmra.mxu1 %v3751_v59 }
 0x553   :  { %1410 = vmatpush1.msra.mxu0 %v3547_v12  ;;  %2491 = vmatpush3.msra.mxu1 %v3182_v26  ;;  %v3810_v26 = vld [vmem:[%s4171_s4 + $0x30] sm:$0xff] }
 0x554   :  { %1411 = vmatprep.subr.mxu0 %v3554_v32  ;;  %2492 = vmatprep.subr.mxu1 %v4228_v20 }
 0x555   :  { %1412 = vmatpush1.msra.mxu0 %v3561_v9  ;;  %2493 = vmatpush3.msra.mxu1 %v3188_v27  ;;  %v3817_v27 = vld [vmem:[%s4171_s4 + $0x20] sm:$0xff] }
 0x556   :  { %1413 = vmatprep.subr.mxu0 %v3568_v18  ;;  %2494 = vmatprep.subr.mxu1 %v4228_v20 }
 0x557   :  { %1414 = vmatpush1.msra.mxu0 %v3575_v21  ;;  %2495 = vmatpush3.msra.mxu1 %v3196_v28  ;;  %v3824_v28 = vld [vmem:[%s4171_s4 + $0x18] sm:$0xff] }
 0x558   :  { %1415 = vmatprep.subr.mxu0 %v3582_v7  ;;  %2496 = vmatprep.subr.mxu1 %v4228_v20  ;;  %4251 = vst [vmem:[#allocation10_spill] sm:$0xff] %v3824_v28 }
 0x559   :  { %1416 = vmatpush1.msra.mxu0 %v3589_v52  ;;  %2497 = vmatpush3.msra.mxu1 %v3204_v29  ;;  %v3831_v29 = vld [vmem:[%s4171_s4 + $0x8] sm:$0xff] }
 0x55a   :  { %1417 = vmatprep.subr.mxu0 %v3596_v15  ;;  %2498 = vmatprep.subr.mxu1 %v4228_v20  ;;  %4252 = vst [vmem:[#allocation11_spill] sm:$0xff] %v3831_v29 }
 0x55b   :  { %1418 = vmatpush1.msra.mxu0 %v3603_v13  ;;  %2499 = vmatpush3.msra.mxu1 %v3212_v30  ;;  %v3838_v30 = vld [vmem:[%s4171_s4] sm:$0xff] }
 0x55c   :  { %1419 = vmatprep.subr.mxu0 %v3610_v22  ;;  %2500 = vmatprep.subr.mxu1 %v4228_v20  ;;  %4253 = vst [vmem:[#allocation5_spill] sm:$0xff] %v3838_v30 }
 0x55d   :  { %1420 = vmatpush1.msra.mxu0 %v3617_v24  ;;  %2501 = vmatpush3.msra.mxu1 %v3220_v33  ;;  %v4254_v33 = vld [vmem:[#allocation4_spill] sm:$0xff] }
 0x55e   :  { %1421 = vmatprep.subr.mxu0 %v3624_v6  ;;  %2502 = vmatprep.subr.mxu1 %v4228_v20 }
 0x55f   :  { %1422 = vmatpush1.msra.mxu0 %v3631_v16  ;;  %2503 = vmatpush3.msra.mxu1 %v3228_v34 }
 0x560   :  { %1423 = vmatprep.subr.mxu0 %v3638_v23  ;;  %2504 = vmatprep.subr.mxu1 %v4228_v20 }
 0x561   :  { %1424 = vmatpush1.msra.mxu0 %v3645_v11  ;;  %2505 = vmatpush3.msra.mxu1 %v3236_v35 }
 0x562   :  { %1425 = vmatprep.subr.mxu0 %v3652_v19  ;;  %2506 = vmatprep.subr.mxu1 %v4228_v20 }
 0x563   :  { %1426 = vmatpush1.msra.mxu0 %v3659_v46  ;;  %2507 = vmatpush3.msra.mxu1 %v3245_v36  ;;  %v4255_v36 = vld [vmem:[#allocation16_spill] sm:$0xff] }
 0x564   :  { %1427 = vmatprep.subr.mxu0 %v3666_v47  ;;  %2508 = vmatprep.subr.mxu1 %v4228_v20 }
 0x565   :  { %1428 = vmatpush1.msra.mxu0 %v3673_v48  ;;  %2509 = vmatpush3.msra.mxu1 %v3252_v37 }
 0x566   :  { %1429 = vmatprep.subr.mxu0 %v3680_v50  ;;  %2510 = vmatprep.subr.mxu1 %v4228_v20 }
 0x567   :  { %1430 = vmatpush1.msra.mxu0 %v3687_v51  ;;  %2511 = vmatpush3.msra.mxu1 %v3259_v38 }
 0x568   :  { %1431 = vmatprep.subr.mxu0 %v3694_v53  ;;  %2512 = vmatprep.subr.mxu1 %v4228_v20 }
 0x569   :  { %1432 = vmatpush1.msra.mxu0 %v3701_v54  ;;  %2513 = vmatpush3.msra.mxu1 %v3266_v43 }
 0x56a   :  { %1433 = vmatprep.subr.mxu0 %v3708_v55  ;;  %2514 = vmatprep.subr.mxu1 %v4228_v20 }
 0x56b   :  { %1434 = vmatpush1.msra.mxu0 %v3715_v56  ;;  %2515 = vmatpush3.msra.mxu1 %v3273_v44 }
 0x56c   :  { %1435 = vmatprep.subr.mxu0 %v3722_v57  ;;  %2516 = vmatprep.subr.mxu1 %v4228_v20 }
 0x56d   :  { %1436 = vmatpush1.msra.mxu0 %v3810_v26  ;;  %2517 = vmatpush3.msra.mxu1 %v3280_v49  ;;  %v4256_v49 = vld [vmem:[#allocation17_spill] sm:$0xff] }
 0x56e   :  { %1437 = vmatprep.subr.mxu0 %v3817_v27  ;;  %2518 = vmatprep.subr.mxu1 %v4228_v20 }
 0x56f   :  { %1438 = vmatpush1.msra.mxu0 %v3824_v28  ;;  %2519 = vmatpush3.msra.mxu1 %v4239_v40 }
 0x570   :  { %1439 = vmatprep.subr.mxu0 %v3831_v29  ;;  %2520 = vmatprep.subr.mxu1 %v4228_v20 }
 0x571   :  { %1440 = vmatpush1.msra.mxu0 %v3838_v30  ;;  %1473 = vmatprep.mubr.f32.mxu0 %v4228_v20 }
 0x572   :  { %2521 = vmatpush3.msra.mxu1 %v4242_v45  ;;  %2522 = vmatprep.mubr.msk.f32.mxu1 %vm2768_vm9, %v4228_v20 }
 0x573   :  { %1577 = vmatprep.subr.mxu0 %v4254_v33  ;;  %2525 = vmatprep.subr.mxu1 %v4228_v20 }
 0x612   :  { %v1307_v34 = vpop.f32.mrf.mxu0  ;;  %v1378_v35 = vpop.f32.mrf.mxu1 }
 0x613   :  { %v1382_v37 = vadd.f32 %v1307_v34, %v4255_v36  ;;  %v1396_v60 = vadd.f32 %v3384_v8, %v1378_v35  ;;  %v3914_v34 = vld [vmem:[%s4171_s4 + $0xe8] sm:$0xff]  ;;  %v3923_v35 = vld [vmem:[%s4171_s4 + $0xd0] sm:$0xff]  ;;  %v3932_v36 = vld [vmem:[%s4171_s4 + $0xb8] sm:$0xff] }
 0x614   :  { %v2489_v38 = vpop.f32.mrf.mxu1  ;;  %v1309_v44 = vpop.f32.mrf.mxu0 }
 0x615   :  { %v2053_v43 = vmul.f32 -1.442695, %v1382_v37  ;;  %v1383_v40 = vadd.f32 %v1309_v44, %v4256_v49  ;;  %v3941_v37 = vld [vmem:[%s4171_s4 + $0xa0] sm:$0xff]  ;;  %v3950_v38 = vld [vmem:[%s4171_s4 + $0x88] sm:$0xff]  ;;  %v3968_v44 = vld [vmem:[%s4171_s4 + $0x58] sm:$0xff] }
 0x616   :  { %v3977_v49 = vld [vmem:[%s4171_s4 + $0x40] sm:$0xff] }
 0x617   :  { %2676 = vpow2.f32 %v2053_v43  ;;  %v2054_v25 = vmul.f32 -1.442695, %v1383_v40  ;;  %v3959_v43 = vld [vmem:[%s4171_s4 + $0x70] sm:$0xff]  ;;  %v3986_v40 = vld [vmem:[%s4171_s4 + $0x28] sm:$0xff] }
 0x618   :  { %4258 = vst [vmem:[#allocation8_spill] sm:$0xff] %v3986_v40 }
 0x619   :  { %2678 = vpow2.f32 %v2054_v25  ;;  %v3996_v25 = vld [vmem:[%s4171_s4 + $0x10] sm:$0xff] }
 0x61a   :  { %4259 = vst [vmem:[#allocation6_spill] sm:$0xff] %v3996_v25 }
 0x624   :  { %v2677_v5 = vpop.eup %2676 }
 0x625   :  { %v1390_v45 = vadd.f32 1.0, %v2677_v5 }
 0x626   :  { %v2679_v39 = vpop.eup %2678 }
 0x627   :  { %2680 = vrcp.f32 %v1390_v45  ;;  %v1391_v1 = vadd.f32 1.0, %v2679_v39  ;;  %v4260_v39 = vld [vmem:[#allocation18_spill] sm:$0xff] }
 0x634   :  { %v2681_v61 = vpop.eup %2680 }
 0x635   :  { %v1397_v62 = vmul.f32 %v2681_v61, %v1396_v60 }
 0x637   :  { %v1398_v0 = vadd.f32 %v1397_v62, %v4257_v63 }
 0x639   :  { %2682 = vtanh.f32 %v1398_v0  ;;  %v4261_v0 = vld [vmem:[#allocation19_spill] sm:$0xff] }
 0x63a   :  { %2684 = vrcp.f32 %v1391_v1 }
 0x646   :  { %v2683_v2 = vpop.eup %2682 }
 0x647   :  { %v1400_v3 = vsub.f32 %v3751_v59, %v2683_v2  ;;  %v2685_v4 = vpop.eup %2684  ;;  %v3905_v59 = vld [vmem:[%s4171_s4 + $0x100] sm:$0xff] }
 0x649   :  { %v1401_v17 = vmul.f32 %v2685_v4, %v1400_v3 }
 0x64b   :  { %v3852_v10 = vadd.f32 %v2683_v2, %v1401_v17 }
 0x64d   :  { %1474 = vmatmul.mubr.f32.vlgmr.msra.gmra.mxu0 %v3852_v10  ;;  %2523 = vmatmul.mubr.f32.vlgmr.msra.gmra.mxu1 %v3852_v10 }
 0x64e   :  { %1578 = vmatpush1.msra.mxu0 %v3547_v12  ;;  %2526 = vmatpush3.msra.mxu1 %v3860_v31 }
 0x64f   :  { %1579 = vmatprep.subr.mxu0 %v3554_v32  ;;  %2527 = vmatprep.subr.mxu1 %v4228_v20 }
 0x650   :  { %1580 = vmatpush1.msra.mxu0 %v3561_v9  ;;  %2528 = vmatpush3.msra.mxu1 %v3869_v14 }
 0x651   :  { %1581 = vmatprep.subr.mxu0 %v3568_v18  ;;  %2529 = vmatprep.subr.mxu1 %v4228_v20 }
 0x652   :  { %1582 = vmatpush1.msra.mxu0 %v3575_v21  ;;  %2530 = vmatpush3.msra.mxu1 %v3878_v41 }
 0x653   :  { %1583 = vmatprep.subr.mxu0 %v3582_v7  ;;  %2531 = vmatprep.subr.mxu1 %v4228_v20 }
 0x654   :  { %1584 = vmatpush1.msra.mxu0 %v3589_v52  ;;  %2532 = vmatpush3.msra.mxu1 %v3887_v42 }
 0x655   :  { %1585 = vmatprep.subr.mxu0 %v3596_v15  ;;  %2533 = vmatprep.subr.mxu1 %v4228_v20 }
 0x656   :  { %1586 = vmatpush1.msra.mxu0 %v3603_v13  ;;  %2534 = vmatpush3.msra.mxu1 %v3896_v58 }
 0x657   :  { %1587 = vmatprep.subr.mxu0 %v3610_v22  ;;  %2535 = vmatprep.subr.mxu1 %v4228_v20 }
 0x658   :  { %1588 = vmatpush1.msra.mxu0 %v3617_v24  ;;  %2536 = vmatpush3.msra.mxu1 %v3905_v59 }
 0x659   :  { %1589 = vmatprep.subr.mxu0 %v3624_v6  ;;  %2537 = vmatprep.subr.mxu1 %v4228_v20 }
 0x65a   :  { %1590 = vmatpush1.msra.mxu0 %v3631_v16  ;;  %2538 = vmatpush3.msra.mxu1 %v3914_v34 }
 0x65b   :  { %1591 = vmatprep.subr.mxu0 %v3638_v23  ;;  %2539 = vmatprep.subr.mxu1 %v4228_v20 }
 0x65c   :  { %1592 = vmatpush1.msra.mxu0 %v3645_v11  ;;  %2540 = vmatpush3.msra.mxu1 %v3923_v35 }
 0x65d   :  { %1593 = vmatprep.subr.mxu0 %v3652_v19  ;;  %2541 = vmatprep.subr.mxu1 %v4228_v20 }
 0x65e   :  { %1594 = vmatpush1.msra.mxu0 %v3659_v46  ;;  %2542 = vmatpush3.msra.mxu1 %v3932_v36 }
 0x65f   :  { %1595 = vmatprep.subr.mxu0 %v3666_v47  ;;  %2543 = vmatprep.subr.mxu1 %v4228_v20 }
 0x660   :  { %1596 = vmatpush1.msra.mxu0 %v3673_v48  ;;  %2544 = vmatpush3.msra.mxu1 %v3941_v37 }
 0x661   :  { %1597 = vmatprep.subr.mxu0 %v3680_v50  ;;  %2545 = vmatprep.subr.mxu1 %v4228_v20 }
 0x662   :  { %1598 = vmatpush1.msra.mxu0 %v3687_v51  ;;  %2546 = vmatpush3.msra.mxu1 %v3950_v38 }
 0x663   :  { %1599 = vmatprep.subr.mxu0 %v3694_v53  ;;  %2547 = vmatprep.subr.mxu1 %v4228_v20 }
 0x664   :  { %1600 = vmatpush1.msra.mxu0 %v3701_v54  ;;  %2548 = vmatpush3.msra.mxu1 %v3959_v43 }
 0x665   :  { %1601 = vmatprep.subr.mxu0 %v3708_v55  ;;  %2549 = vmatprep.subr.mxu1 %v4228_v20 }
 0x666   :  { %1602 = vmatpush1.msra.mxu0 %v3715_v56  ;;  %2550 = vmatpush3.msra.mxu1 %v3968_v44 }
 0x667   :  { %1603 = vmatprep.subr.mxu0 %v3722_v57  ;;  %2551 = vmatprep.subr.mxu1 %v4228_v20 }
 0x668   :  { %1604 = vmatpush1.msra.mxu0 %v3810_v26  ;;  %2552 = vmatpush3.msra.mxu1 %v3977_v49 }
 0x669   :  { %1605 = vmatprep.subr.mxu0 %v3817_v27  ;;  %2553 = vmatprep.subr.mxu1 %v4228_v20 }
 0x66a   :  { %1606 = vmatpush1.msra.mxu0 %v3824_v28  ;;  %2554 = vmatpush3.msra.mxu1 %v3986_v40 }
 0x66b   :  { %1607 = vmatprep.subr.mxu0 %v3831_v29  ;;  %2555 = vmatprep.subr.mxu1 %v4228_v20  ;;  %v4262_v29 = vld [vmem:[#allocation26_spill] sm:$0xff] }
 0x66c   :  { %1608 = vmatpush1.msra.mxu0 %v3838_v30  ;;  %1641 = vmatprep.mubr.f32.mxu0 %v4228_v20 }
 0x66d   :  { %2556 = vmatpush3.msra.mxu1 %v3996_v25  ;;  %2557 = vmatprep.mubr.msk.f32.mxu1 %vm2768_vm9, %v4228_v20 }
 0x66e   :  { %1745 = vmatprep.subr.mxu0 %v4254_v33  ;;  %2560 = vmatprep.subr.mxu1 %v4228_v20 }
 0x70d   :  { %v1475_v5 = vpop.f32.mrf.mxu0  ;;  %v1546_v45 = vpop.f32.mrf.mxu1 }
 0x70e   :  { %v1550_v60 = vadd.f32 %v1475_v5, %v4260_v39  ;;  %v1564_v33 = vadd.f32 %v3384_v8, %v1546_v45  ;;  %v4263_v8 = vld [vmem:[#allocation10_spill] sm:$0xff] }
 0x70f   :  { %v2524_v61 = vpop.f32.mrf.mxu1  ;;  %v1477_v63 = vpop.f32.mrf.mxu0 }
 0x710   :  { %v2055_v62 = vmul.f32 -1.442695, %v1550_v60  ;;  %v1551_v1 = vadd.f32 %v1477_v63, %v4261_v0 }
 0x712   :  { %2686 = vpow2.f32 %v2055_v62  ;;  %v2056_v2 = vmul.f32 -1.442695, %v1551_v1 }
 0x714   :  { %2688 = vpow2.f32 %v2056_v2  ;;  %v4272_v2 = vld [vmem:[#allocation23_spill] sm:$0xff] }
 0x71f   :  { %v2687_v3 = vpop.eup %2686 }
 0x720   :  { %v1558_v4 = vadd.f32 1.0, %v2687_v3 }
 0x721   :  { %v2689_v17 = vpop.eup %2688 }
 0x722   :  { %2690 = vrcp.f32 %v1558_v4  ;;  %v1559_v28 = vadd.f32 1.0, %v2689_v17 }
 0x72f   :  { %v2691_v25 = vpop.eup %2690 }
 0x730   :  { %v1565_v30 = vmul.f32 %v2691_v25, %v1564_v33  ;;  %v4271_v25 = vld [vmem:[#allocation22_spill] sm:$0xff] }
 0x732   :  { %v1566_v40 = vadd.f32 %v1565_v30, %v4262_v29  ;;  %v1922_v29 = vld [vmem:[%s4175_s7 + $0x78] sm:$0xff]  ;;  %v1921_v30 = vld [vmem:[%s4175_s7 + $0x70] sm:$0xff] }
 0x734   :  { %2692 = vtanh.f32 %v1566_v40 }
 0x735   :  { %2694 = vrcp.f32 %v1559_v28 }
 0x741   :  { %v2693_v5 = vpop.eup %2692 }
 0x742   :  { %v1568_v39 = vsub.f32 %v3852_v10, %v2693_v5  ;;  %v2695_v60 = vpop.eup %2694  ;;  %v1920_v10 = vld [vmem:[%s4175_s7 + $0x68] sm:$0xff] }
 0x744   :  { %v1569_v61 = vmul.f32 %v2695_v60, %v1568_v39 }
 0x746   :  { %v4008_v62 = vadd.f32 %v2693_v5, %v1569_v61  ;;  %v4273_v61 = vld [vmem:[#allocation28_spill] sm:$0xff] }
 0x748   :  { %1642 = vmatmul.mubr.f32.vlgmr.msra.gmra.mxu0 %v4008_v62  ;;  %2558 = vmatmul.mubr.f32.vlgmr.msra.gmra.mxu1 %v4008_v62 }
 0x749   :  { %1746 = vmatpush1.msra.mxu0 %v3547_v12  ;;  %2561 = vmatpush3.msra.mxu1 %v3860_v31  ;;  %v4264_v12 = vld [vmem:[#allocation8_spill] sm:$0xff]  ;;  %v1919_v31 = vld [vmem:[%s4175_s7 + $0x60] sm:$0xff] }
 0x74a   :  { %1747 = vmatprep.subr.mxu0 %v3554_v32  ;;  %2562 = vmatprep.subr.mxu1 %v4228_v20  ;;  %v4265_v32 = vld [vmem:[#allocation11_spill] sm:$0xff] }
 0x74b   :  { %1748 = vmatpush1.msra.mxu0 %v3561_v9  ;;  %2563 = vmatpush3.msra.mxu1 %v3869_v14  ;;  %v4266_v9 = vld [vmem:[#allocation5_spill] sm:$0xff]  ;;  %v1918_v14 = vld [vmem:[%s4175_s7 + $0x58] sm:$0xff] }
 0x74c   :  { %1749 = vmatprep.subr.mxu0 %v3568_v18  ;;  %2564 = vmatprep.subr.mxu1 %v4228_v20  ;;  %v4267_v18 = vld [vmem:[#allocation6_spill] sm:$0xff] }
 0x74d   :  { %1750 = vmatpush1.msra.mxu0 %v3575_v21  ;;  %2565 = vmatpush3.msra.mxu1 %v3878_v41  ;;  %v1917_v41 = vld [vmem:[%s4175_s7 + $0x50] sm:$0xff] }
 0x74e   :  { %1751 = vmatprep.subr.mxu0 %v3582_v7  ;;  %2566 = vmatprep.subr.mxu1 %v4228_v20 }
 0x74f   :  { %1752 = vmatpush1.msra.mxu0 %v3589_v52  ;;  %2567 = vmatpush3.msra.mxu1 %v3887_v42  ;;  %v4268_v52 = vld [vmem:[#allocation20_spill] sm:$0xff] }
 0x750   :  { %1753 = vmatprep.subr.mxu0 %v3596_v15  ;;  %2568 = vmatprep.subr.mxu1 %v4228_v20  ;;  %v1916_v42 = vld [vmem:[%s4175_s7 + $0x48] sm:$0xff] }
 0x751   :  { %1754 = vmatpush1.msra.mxu0 %v3603_v13  ;;  %2569 = vmatpush3.msra.mxu1 %v3896_v58  ;;  %v1915_v58 = vld [vmem:[%s4175_s7 + $0x40] sm:$0xff] }
 0x752   :  { %1755 = vmatprep.subr.mxu0 %v3610_v22  ;;  %2570 = vmatprep.subr.mxu1 %v4228_v20 }
 0x753   :  { %1756 = vmatpush1.msra.mxu0 %v3617_v24  ;;  %2571 = vmatpush3.msra.mxu1 %v3905_v59  ;;  %v1914_v59 = vld [vmem:[%s4175_s7 + $0x38] sm:$0xff] }
 0x754   :  { %1757 = vmatprep.subr.mxu0 %v3624_v6  ;;  %2572 = vmatprep.subr.mxu1 %v4228_v20  ;;  %v4269_v6 = vld [vmem:[#allocation21_spill] sm:$0xff] }
 0x755   :  { %1758 = vmatpush1.msra.mxu0 %v3631_v16  ;;  %2573 = vmatpush3.msra.mxu1 %v3914_v34  ;;  %v1913_v34 = vld [vmem:[%s4175_s7 + $0x30] sm:$0xff] }
 0x756   :  { %1759 = vmatprep.subr.mxu0 %v3638_v23  ;;  %2574 = vmatprep.subr.mxu1 %v4228_v20 }
 0x757   :  { %1760 = vmatpush1.msra.mxu0 %v3645_v11  ;;  %2575 = vmatpush3.msra.mxu1 %v3923_v35  ;;  %v1912_v35 = vld [vmem:[%s4175_s7 + $0x28] sm:$0xff] }
 0x758   :  { %1761 = vmatprep.subr.mxu0 %v3652_v19  ;;  %2576 = vmatprep.subr.mxu1 %v4228_v20 }
 0x759   :  { %1762 = vmatpush1.msra.mxu0 %v3659_v46  ;;  %2577 = vmatpush3.msra.mxu1 %v3932_v36  ;;  %v1911_v36 = vld [vmem:[%s4175_s7 + $0x20] sm:$0xff] }
 0x75a   :  { %1763 = vmatprep.subr.mxu0 %v3666_v47  ;;  %2578 = vmatprep.subr.mxu1 %v4228_v20  ;;  %v4083_v47 = vld [vmem:[%s4174_s6] ss:$0 sm:$0xff] }
 0x75b   :  { %1764 = vmatpush1.msra.mxu0 %v3673_v48  ;;  %2579 = vmatpush3.msra.mxu1 %v3941_v37  ;;  %v1910_v37 = vld [vmem:[%s4175_s7 + $0x18] sm:$0xff] }
 0x75c   :  { %1765 = vmatprep.subr.mxu0 %v3680_v50  ;;  %2580 = vmatprep.subr.mxu1 %v4228_v20 }
 0x75d   :  { %1766 = vmatpush1.msra.mxu0 %v3687_v51  ;;  %2581 = vmatpush3.msra.mxu1 %v3950_v38  ;;  %v1909_v38 = vld [vmem:[%s4175_s7 + $0x10] sm:$0xff] }
 0x75e   :  { %1767 = vmatprep.subr.mxu0 %v3694_v53  ;;  %2582 = vmatprep.subr.mxu1 %v4228_v20  ;;  %v4270_v53 = vld [vmem:[#allocation29_spill] sm:$0xff] }
 0x75f   :  { %1768 = vmatpush1.msra.mxu0 %v3701_v54  ;;  %2583 = vmatpush3.msra.mxu1 %v3959_v43  ;;  %v1908_v43 = vld [vmem:[%s4175_s7 + $0x8] sm:$0xff] }
 0x760   :  { %1769 = vmatprep.subr.mxu0 %v3708_v55  ;;  %2584 = vmatprep.subr.mxu1 %v4228_v20 }
 0x761   :  { %1770 = vmatpush1.msra.mxu0 %v3715_v56  ;;  %2585 = vmatpush3.msra.mxu1 %v3968_v44  ;;  %v1907_v44 = vld [vmem:[%s4175_s7] sm:$0xff] }
 0x762   :  { %1771 = vmatprep.subr.mxu0 %v3722_v57  ;;  %2586 = vmatprep.subr.mxu1 %v4228_v20 }
 0x763   :  { %1772 = vmatpush1.msra.mxu0 %v3810_v26  ;;  %2587 = vmatpush3.msra.mxu1 %v3977_v49 }
 0x764   :  { %1773 = vmatprep.subr.mxu0 %v3817_v27  ;;  %2588 = vmatprep.subr.mxu1 %v4228_v20 }
 0x765   :  { %1774 = vmatpush1.msra.mxu0 %v4263_v8  ;;  %2589 = vmatpush3.msra.mxu1 %v4264_v12 }
 0x766   :  { %1775 = vmatprep.subr.mxu0 %v4265_v32  ;;  %2590 = vmatprep.subr.mxu1 %v4228_v20 }
 0x767   :  { %1776 = vmatpush1.msra.mxu0 %v4266_v9  ;;  %1809 = vmatprep.mubr.f32.mxu0 %v4228_v20 }
 0x768   :  { %2591 = vmatpush3.msra.mxu1 %v4267_v18  ;;  %2592 = vmatprep.mubr.msk.f32.mxu1 %vm2768_vm9, %v4228_v20 }
 0x769   :  { %2595 = vmatprep.subr.mxu0 %v4228_v20 }
 0x808   :  { %v1643_v21 = vpop.f32.mrf.mxu0  ;;  %v1714_v7 = vpop.f32.mrf.mxu1 }
 0x809   :  { %v1718_v15 = vadd.f32 %v1643_v21, %v4268_v52  ;;  %v1732_v48 = vadd.f32 %v4083_v47, %v1714_v7  ;;  %v2061_v7 = vld [vmem:[%s4176_s8] ss:$0 sm:$0xff] }
 0x80a   :  { %v2559_v13 = vpop.f32.mrf.mxu1  ;;  %v1645_v24 = vpop.f32.mrf.mxu0 }
 0x80b   :  { %v2057_v22 = vmul.f32 -1.442695, %v1718_v15  ;;  %v1719_v16 = vadd.f32 %v1645_v24, %v4269_v6 }
 0x80d   :  { %2696 = vpow2.f32 %v2057_v22  ;;  %v2058_v23 = vmul.f32 -1.442695, %v1719_v16 }
 0x80f   :  { %2698 = vpow2.f32 %v2058_v23 }
 0x81a   :  { %v2697_v11 = vpop.eup %2696 }
 0x81b   :  { %v1726_v19 = vadd.f32 1.0, %v2697_v11 }
 0x81c   :  { %v2699_v46 = vpop.eup %2698 }
 0x81d   :  { %2700 = vrcp.f32 %v1726_v19  ;;  %v1727_v55 = vadd.f32 1.0, %v2699_v46 }
 0x82a   :  { %v2701_v50 = vpop.eup %2700 }
 0x82b   :  { %v1733_v51 = vmul.f32 %v2701_v50, %v1732_v48 }
 0x82d   :  { %v1734_v54 = vadd.f32 %v1733_v51, %v4270_v53 }
 0x82f   :  { %2702 = vtanh.f32 %v1734_v54 }
 0x830   :  { %2704 = vrcp.f32 %v1727_v55 }
 0x83c   :  { %v2703_v56 = vpop.eup %2702 }
 0x83d   :  { %v1736_v57 = vsub.f32 %v4008_v62, %v2703_v56  ;;  %v2705_v26 = vpop.eup %2704 }
 0x83f   :  { %v1737_v27 = vmul.f32 %v2705_v26, %v1736_v57 }
 0x841   :  { %v4088_v28 = vadd.f32 %v2703_v56, %v1737_v27 }
 0x843   :  { %1810 = vmatmul.mubr.f32.vlgmr.msra.gmra.mxu0 %v4088_v28  ;;  %2593 = vmatmul.mubr.f32.vlgmr.msra.gmra.mxu1 %v4088_v28 }
 0x844   :  { %2627 = vmatprep.mubr.msk.f32.mxu0 %vm2768_vm9, %v4228_v20  ;;  %2596 = vmatpush3.msra.mxu0 %v1922_v29 }
 0x845   :  { %2597 = vmatprep.subr.mxu0 %v4228_v20 }
 0x846   :  { %2598 = vmatpush3.msra.mxu0 %v1921_v30 }
 0x847   :  { %2599 = vmatprep.subr.mxu0 %v4228_v20 }
 0x848   :  { %2600 = vmatpush3.msra.mxu0 %v1920_v10 }
 0x849   :  { %2601 = vmatprep.subr.mxu0 %v4228_v20 }
 0x84a   :  { %2602 = vmatpush3.msra.mxu0 %v1919_v31 }
 0x84b   :  { %2603 = vmatprep.subr.mxu0 %v4228_v20 }
 0x84c   :  { %2604 = vmatpush3.msra.mxu0 %v1918_v14 }
 0x84d   :  { %2605 = vmatprep.subr.mxu0 %v4228_v20 }
 0x84e   :  { %2606 = vmatpush3.msra.mxu0 %v1917_v41 }
 0x84f   :  { %2607 = vmatprep.subr.mxu0 %v4228_v20 }
 0x850   :  { %2608 = vmatpush3.msra.mxu0 %v1916_v42 }
 0x851   :  { %2609 = vmatprep.subr.mxu0 %v4228_v20 }
 0x852   :  { %2610 = vmatpush3.msra.mxu0 %v1915_v58 }
 0x853   :  { %2611 = vmatprep.subr.mxu0 %v4228_v20 }
 0x854   :  { %2612 = vmatpush3.msra.mxu0 %v1914_v59 }
 0x855   :  { %2613 = vmatprep.subr.mxu0 %v4228_v20 }
 0x856   :  { %2614 = vmatpush3.msra.mxu0 %v1913_v34 }
 0x857   :  { %2615 = vmatprep.subr.mxu0 %v4228_v20 }
 0x858   :  { %2616 = vmatpush3.msra.mxu0 %v1912_v35 }
 0x859   :  { %2617 = vmatprep.subr.mxu0 %v4228_v20 }
 0x85a   :  { %2618 = vmatpush3.msra.mxu0 %v1911_v36 }
 0x85b   :  { %2619 = vmatprep.subr.mxu0 %v4228_v20 }
 0x85c   :  { %2620 = vmatpush3.msra.mxu0 %v1910_v37 }
 0x85d   :  { %2621 = vmatprep.subr.mxu0 %v4228_v20 }
 0x85e   :  { %2622 = vmatpush3.msra.mxu0 %v1909_v38 }
 0x85f   :  { %2623 = vmatprep.subr.mxu0 %v4228_v20 }
 0x860   :  { %2624 = vmatpush3.msra.mxu0 %v1908_v43 }
 0x861   :  { %2625 = vmatprep.subr.mxu0 %v4228_v20 }
 0x862   :  { %2626 = vmatpush3.msra.mxu0 %v1907_v44 }
 0x903   :  { %v1811_v49 = vpop.f32.mrf.mxu0  ;;  %v1882_v40 = vpop.f32.mrf.mxu1 }
 0x904   :  { %v1886_v45 = vadd.f32 %v1811_v49, %v4271_v25  ;;  %v1900_v39 = vadd.f32 %v4083_v47, %v1882_v40 }
 0x905   :  { %v2594_v63 = vpop.f32.mrf.mxu1  ;;  %v1813_v1 = vpop.f32.mrf.mxu0 }
 0x906   :  { %v2059_v0 = vmul.f32 -1.442695, %v1886_v45  ;;  %v1887_v3 = vadd.f32 %v1813_v1, %v4272_v2 }
 0x908   :  { %2706 = vpow2.f32 %v2059_v0  ;;  %v2060_v4 = vmul.f32 -1.442695, %v1887_v3 }
 0x90a   :  { %2708 = vpow2.f32 %v2060_v4 }
 0x915   :  { %v2707_v17 = vpop.eup %2706 }
 0x916   :  { %v1894_v33 = vadd.f32 1.0, %v2707_v17 }
 0x917   :  { %v2709_v5 = vpop.eup %2708 }
 0x918   :  { %2710 = vrcp.f32 %v1894_v33  ;;  %v1895_v8 = vadd.f32 1.0, %v2709_v5 }
 0x925   :  { %v2711_v20 = vpop.eup %2710 }
 0x926   :  { %v1901_v60 = vmul.f32 %v2711_v20, %v1900_v39 }
 0x928   :  { %v1902_v62 = vadd.f32 %v1901_v60, %v4273_v61 }
 0x92a   :  { %2712 = vtanh.f32 %v1902_v62 }
 0x92b   :  { %2714 = vrcp.f32 %v1895_v8 }
 0x937   :  { %v2713_v12 = vpop.eup %2712 }
 0x938   :  { %v1904_v32 = vsub.f32 %v4088_v28, %v2713_v12  ;;  %v2715_v9 = vpop.eup %2714 }
 0x93a   :  { %v1905_v18 = vmul.f32 %v2715_v9, %v1904_v32 }
 0x93c   :  { %v1906_v21 = vadd.f32 %v2713_v12, %v1905_v18 }
 0x93e   :  { %2628 = vmatmul.mubr.f32.vlgmr.msra.gmra.mxu0 %v1906_v21 }
 0x9fe   :  { %v1996_v52 = vpop.f32.mrf.mxu0 }
 0x9ff   :  { %v1997_v15 = vadd.f32 %v2061_v7, %v1996_v52 }
 0xa00   :  { %v2629_v13 = vpop.f32.mrf.mxu0 }
 0xa01   :  { %2000 = vst [vmem:[%s4177_s9] sm:$0xff] %v1997_v15 }

</bundles_post_ra>
